<compile_context>
chip_gen: v7x
topology: tpu7x:2x2x1
jax: 0.10.0
libtpu: 0.0.40
codegen_flags: <defaults>
</compile_context>

<pallas_src>
import functools

import jax
import jax.numpy as jnp
from jax.experimental import pallas as pl
from jax.experimental.pallas import tpu as pltpu

LANES = 128


def _round_up(v, m):
  return (v + m - 1) // m * m


# ----------------------------------------------------------------------------- kernels

def _conv1_kernel(x_ref, w_ref, scale_ref, bias_ref, mask_ref, o_ref, *, ho, wv, stride):
  """conv1 (3x3, stride s, pad 1) + folded BN + ReLU.

  x_ref    : [s, s, L1+2, Cin]  space-to-depth'ed, spatially-flattened, padded input (bf16)
  w_ref    : [9, Cin, Nt]       (ki,kj)-major conv1 weights (bf16)
  scale/bias: [1, Nt]           folded BN1 (f32)
  mask_ref : [M, 1]             1.0 on valid flat columns, 0.0 on halo columns (f32)
  o_ref    : [L2+2, Nt]         conv1 activation written in conv2's zero-ring padded flat
                                layout (bf16), L2 = (Ho+2)*(Wo+2)
  """
  m = ho * wv
  n = w_ref.shape[-1]
  acc = jnp.zeros((m, n), jnp.float32)
  for ki in range(3):                              # fused im2col: 9 shifted-slice matmuls
    for kj in range(3):
      pi, pj = ki % stride, kj % stride
      start = (ki // stride) * wv + (kj // stride)
      patch = x_ref[pi, pj, start:start + m, :]    # [M, Cin] bf16, contiguous slice
      acc += jnp.dot(patch, w_ref[3 * ki + kj], preferred_element_type=jnp.float32)
  y = jnp.maximum(acc * scale_ref[...] + bias_ref[...], 0.0) * mask_ref[...]
  head = wv + 1                                    # zero-ring rows before/after the interior
  zeros = jnp.zeros((head, n), o_ref.dtype)
  o_ref[0:head, :] = zeros
  o_ref[head:head + m, :] = y.astype(o_ref.dtype)
  o_ref[head + m:head + m + head, :] = zeros


def _conv2_residual_kernel(y_ref, xs_ref, w2_ref, s2_ref, b2_ref,
                           wsc_ref, ssc_ref, bsc_ref, gate_ref, o_ref,
                           *, ho, wv, sc_off):
  """conv2 (3x3, stride 1, pad 1) + BN2, fused with the shortcut (1x1 conv + BN, or identity
  expressed as a padded-identity 1x1), the gate scaling and the final ReLU:
      out = relu(shortcut(x) + bn2(conv2(y1)) * gate[b])

  y_ref  : [L2+2, Np]   zero-ring padded conv1 output (bf16)
  xs_ref : [1, 1, L1+2, Cin]  the shortcut phase of the space-to-depth input (bf16)
  gate   : [B] f32 in SMEM (scalar per image)
  o_ref  : [M, Nt]      flat NHWC output tile (f32, lane-dense)
  """
  m = ho * wv
  n = w2_ref.shape[-1]
  acc = jnp.zeros((m, n), jnp.float32)
  for ki in range(3):                              # fused im2col over the padded conv1 output
    for kj in range(3):
      start = ki * wv + kj
      acc += jnp.dot(y_ref[start:start + m, :], w2_ref[3 * ki + kj],
                     preferred_element_type=jnp.float32)
  main = acc * s2_ref[...] + b2_ref[...]
  short = jnp.dot(xs_ref[0, 0, sc_off:sc_off + m, :], wsc_ref[...],
                  preferred_element_type=jnp.float32)
  short = short * ssc_ref[...] + bsc_ref[...]
  g = gate_ref[pl.program_id(0)]                   # scalar gate from SMEM
  o_ref[...] = jnp.maximum(short + main * g, 0.0).astype(o_ref.dtype)


# ----------------------------------------------------------------------------- host helpers

def _fold_bn(gamma, beta, mean, var, eps=1e-5):
  scale = gamma / jnp.sqrt(var + eps)
  return scale, beta - mean * scale


def _pad_last(a, n):
  pad = n - a.shape[-1]
  if pad == 0:
    return a
  return jnp.pad(a, [(0, 0)] * (a.ndim - 1) + [(0, pad)])


def _conv_w_to_mm(w, k_pad, n_pad):
  """[O, I, 3, 3] -> [9, k_pad, n_pad] in (ki, kj)-major order, bf16."""
  o, i = w.shape[0], w.shape[1]
  wt = jnp.transpose(w, (2, 3, 1, 0)).reshape(9, i, o)
  wt = jnp.pad(wt, ((0, 0), (0, k_pad - i), (0, n_pad - o)))
  return wt.astype(jnp.bfloat16)


def _space_to_depth_flat(x_nhwc, stride, wv):
  """pad(1px) -> space-to-depth(stride) -> pad cols to wv -> flatten spatial (+2 halo rows).
  Returns [B, stride, stride, L1+2, Cin] with s2d[b,pi,pj,r*wv+c] = x_pad[b, r*s+pi, c*s+pj]."""
  B, H, W, C = x_nhwc.shape
  xp = jnp.pad(x_nhwc, ((0, 0), (1, 1), (1, 1), (0, 0)))
  hh, wh = (H + 2) // stride, (W + 2) // stride
  xs = xp.reshape(B, hh, stride, wh, stride, C).transpose(0, 2, 4, 1, 3, 5)
  xs = jnp.pad(xs, ((0, 0), (0, 0), (0, 0), (0, 0), (0, wv - wh), (0, 0)))
  xs = xs.reshape(B, stride, stride, hh * wv, C)
  return jnp.pad(xs, ((0, 0), (0, 0), (0, 0), (0, 2), (0, 0)))


# ----------------------------------------------------------------------------- forward

def basic_block_forward(x_nchw, params, stride, temperature=1.0):
  """Returns (out_nchw, gate1) matching the PyTorch BasicBlock.forward (eval mode)."""
  B, cin, H, W = x_nchw.shape
  assert H % stride == 0 and W % stride == 0
  planes = params["conv1_w"].shape[0]
  ho, wo = H // stride, W // stride
  wv = wo + 2                                  # flat-spatial pitch (= conv2's padded width)
  m = ho * wv                                  # flat rows produced per image
  l1 = ((H + 2) // stride) * wv                # flat length of the s2d conv1/shortcut input
  l2 = (ho + 2) * wv                           # flat length of the padded conv1 output
  n_pad = _round_up(planes, LANES)             # lane-dense output channels
  nt = n_pad // LANES

  x_nhwc = jnp.transpose(x_nchw, (0, 2, 3, 1))

  # ---- gate path: avg-pool + two tiny FCs; plain JAX (too small for the MXU) --------------
  pooled = jnp.mean(x_nhwc, axis=(1, 2))                                       # [B, Cin]
  s1, c1 = _fold_bn(*params["fc1bn"])
  h = jnp.maximum((pooled @ params["fc1_w"] + params["fc1_b"]) * s1 + c1, 0.0)
  logits = (h @ params["fc2_w"] + params["fc2_b"]) / temperature
  soft = jax.nn.softmax(logits, axis=-1)
  hard = jax.nn.one_hot(jnp.argmax(soft, axis=-1), 2, dtype=jnp.float32)       # force_hard
  gate = hard[:, 1]                                                            # [B] f32

  # ---- weight / BN prep (host, once, bf16 matmul operands, f32 epilogue params) -----------
  w1 = _conv_w_to_mm(params["conv1_w"], cin, n_pad)            # [9, Cin, Np]
  w2 = _conv_w_to_mm(params["conv2_w"], n_pad, n_pad)          # [9, Np, Np]
  sc1, bi1 = _fold_bn(*params["bn1"])
  sc2, bi2 = _fold_bn(*params["bn2"])
  sc1 = _pad_last(sc1, n_pad).reshape(1, n_pad)
  bi1 = _pad_last(bi1, n_pad).reshape(1, n_pad)
  sc2 = _pad_last(sc2, n_pad).reshape(1, n_pad)
  bi2 = _pad_last(bi2, n_pad).reshape(1, n_pad)

  if stride != 1 or cin != planes:                             # projection shortcut
    wsc = _pad_last(params["sconv_w"], n_pad).astype(jnp.bfloat16)
    ssc, bsc = _fold_bn(*params["sbn"])
    ssc = _pad_last(ssc, n_pad).reshape(1, n_pad)
    bsc = _pad_last(bsc, n_pad).reshape(1, n_pad)
  else:                                                        # identity shortcut as 1x1 eye
    wsc = _pad_last(jnp.eye(cin, dtype=jnp.float32), n_pad).astype(jnp.bfloat16)
    ssc = jnp.ones((1, n_pad), jnp.float32)
    bsc = jnp.zeros((1, n_pad), jnp.float32)
  sc_off = (1 // stride) * (wv + 1)                            # shortcut offset within phase

  # valid-column mask: halo columns of the flat layout double as conv2's zero ring
  mask = (jnp.arange(m, dtype=jnp.int32) % wv < wo).astype(jnp.float32).reshape(m, 1)

  xs = _space_to_depth_flat(x_nhwc, stride, wv).astype(jnp.bfloat16)   # [B, s, s, L1+2, Cin]

  cp = pltpu.CompilerParams(
      dimension_semantics=("parallel", "parallel"),
      vmem_limit_bytes=32 * 1024 * 1024,
  )

  # ---- kernel 1: conv1 + bn1 + relu (fused im2col), padded-layout output ------------------
  y1 = pl.pallas_call(
      functools.partial(_conv1_kernel, ho=ho, wv=wv, stride=stride),
      out_shape=jax.ShapeDtypeStruct((B, l2 + 2, n_pad), jnp.bfloat16),
      grid=(B, nt),
      in_specs=[
          pl.BlockSpec((None, stride, stride, l1 + 2, cin), lambda b, n: (b, 0, 0, 0, 0)),
          pl.BlockSpec((9, cin, LANES), lambda b, n: (0, 0, n)),
          pl.BlockSpec((1, LANES), lambda b, n: (0, n)),
          pl.BlockSpec((1, LANES), lambda b, n: (0, n)),
          pl.BlockSpec((m, 1), lambda b, n: (0, 0)),
      ],
      out_specs=pl.BlockSpec((None, l2 + 2, LANES), lambda b, n: (b, 0, n)),
      compiler_params=cp,
  )(xs, w1, sc1, bi1, mask)

  # ---- kernel 2: conv2 + bn2 + shortcut + gate scale + relu (fully fused epilogue) --------
  out_flat = pl.pallas_call(
      functools.partial(_conv2_residual_kernel, ho=ho, wv=wv, sc_off=sc_off),
      out_shape=jax.ShapeDtypeStruct((B, m, n_pad), jnp.float32),
      grid=(B, nt),
      in_specs=[
          pl.BlockSpec((None, l2 + 2, n_pad), lambda b, n: (b, 0, 0)),
          pl.BlockSpec((None, 1, 1, l1 + 2, cin),
                       lambda b, n: (b, 1 % stride, 1 % stride, 0, 0)),   # shortcut phase pick
          pl.BlockSpec((9, n_pad, LANES), lambda b, n: (0, 0, n)),
          pl.BlockSpec((1, LANES), lambda b, n: (0, n)),
          pl.BlockSpec((1, LANES), lambda b, n: (0, n)),
          pl.BlockSpec((cin, LANES), lambda b, n: (0, n)),
          pl.BlockSpec((1, LANES), lambda b, n: (0, n)),
          pl.BlockSpec((1, LANES), lambda b, n: (0, n)),
          pl.BlockSpec(memory_space=pltpu.MemorySpace.SMEM),              # gate scalar in SMEM
      ],
      out_specs=pl.BlockSpec((None, m, LANES), lambda b, n: (b, 0, n)),
      compiler_params=cp,
  )(y1, xs, w2, sc2, bi2, wsc, ssc, bsc, gate)

  # ---- unflatten / strip halo columns and channel padding ---------------------------------
  out = out_flat.reshape(B, ho, wv, n_pad)[:, :, :wo, :planes]
  out_nchw = jnp.transpose(out, (0, 3, 1, 2))
  gate1 = gate.reshape(B, 1, 1)                # matches torch w[:, 1] of shape [B, 1, 1]
  return out_nchw, gate1


# ----------------------------------------------------------------------------- params

def make_params(key, in_planes, planes):
  ks = jax.random.split(key, 8)

  def bn_params(n):
    gamma = 1.0 + 0.1 * jnp.arange(n, dtype=jnp.float32)
    beta = 0.05 * jnp.arange(n, dtype=jnp.float32)
    mean = 0.01 * (jnp.arange(n, dtype=jnp.float32) - n / 2.0)
    var = 1.0 + 0.1 * jnp.arange(n, dtype=jnp.float32)
    return (gamma, beta, mean, var)

  return {
      "conv1_w": 0.1 * jax.random.normal(ks[0], (planes, in_planes, 3, 3), jnp.float32),
      "bn1": bn_params(planes),
      "conv2_w": 0.1 * jax.random.normal(ks[1], (planes, planes, 3, 3), jnp.float32),
      "bn2": bn_params(planes),
      "fc1_w": 0.1 * jax.random.normal(ks[2], (in_planes, 16), jnp.float32),
      "fc1_b": 0.01 * jnp.arange(16, dtype=jnp.float32),
      "fc1bn": bn_params(16),
      "fc2_w": 0.1 * jax.random.normal(ks[3], (16, 2), jnp.float32),
      "fc2_b": jnp.array([0.1, 2.0], jnp.float32),   # matches fc2.bias.data[0]=0.1, [1]=2
      # shortcut (1x1 conv as a [Cin, planes] matmul) — used when stride != 1 or Cin != planes
      "sconv_w": 0.1 * jax.random.normal(ks[4], (in_planes, planes), jnp.float32),
      "sbn": bn_params(planes),
  }


# ----------------------------------------------------------------------------- main

if __name__ == "__main__":
  key = jax.random.PRNGKey(0)
  kx, kp = jax.random.split(key)

  B, in_planes, H, W = 2, 4, 16, 16
  planes, stride = 8, 2

  x = jax.random.normal(kx, (B, in_planes, H, W), jnp.float32)
  params = make_params(kp, in_planes, planes)

  fwd = jax.jit(functools.partial(basic_block_forward, stride=stride, temperature=1.0))
  out, gate1 = fwd(x, params)
  jax.block_until_ready((out, gate1))

  assert out.shape == (B, planes, H // stride, W // stride), out.shape
  assert gate1.shape == (B, 1, 1), gate1.shape
  print("KERNEL_OK")
</pallas_src>

<mosaic_0001>
module attributes {stable_mosaic.version = 11 : i64} {
  func.func @_conv1_kernel(%arg0: i32, %arg1: i32, %arg2: memref<1x2x2x92x4xbf16, #tpu.memory_space<vmem>>, %arg3: memref<9x4x128xbf16, #tpu.memory_space<vmem>>, %arg4: memref<1x128xf32, #tpu.memory_space<vmem>>, %arg5: memref<1x128xf32, #tpu.memory_space<vmem>>, %arg6: memref<80x1xf32, #tpu.memory_space<vmem>>, %arg7: memref<1x102x128xbf16, #tpu.memory_space<vmem>>) attributes {dimension_semantics = [#tpu.dimension_semantics<parallel>, #tpu.dimension_semantics<parallel>], iteration_bounds = array<i64: 2, 1>, scalar_prefetch = 0 : i64, scratch_operands = 0 : i64, tpu.core_type = #tpu.core_type<tc>, window_params = [{transform_indices = @transform_0, window_bounds = array<i64: 1, 2, 2, 92, 4>}, {transform_indices = @transform_1, window_bounds = array<i64: 9, 4, 128>}, {transform_indices = @transform_2, window_bounds = array<i64: 1, 128>}, {transform_indices = @transform_3, window_bounds = array<i64: 1, 128>}, {pipeline_mode = #tpu.pipeline_mode<synchronous>, transform_indices = @transform_4, window_bounds = array<i64: 80, 1>}, {transform_indices = @transform_5, window_bounds = array<i64: 1, 102, 128>}]} {
    %cst = arith.constant 0.000000e+00 : f32
    %0 = vector.broadcast %cst : f32 to vector<80x128xf32>
    %c0 = arith.constant 0 : index
    %c0_0 = arith.constant 0 : index
    %c0_1 = arith.constant 0 : index
    %c0_2 = arith.constant 0 : index
    %c0_3 = arith.constant 0 : index
    %1 = vector.load %arg2[%c0, %c0_0, %c0_1, %c0_2, %c0_3] : memref<1x2x2x92x4xbf16, #tpu.memory_space<vmem>>, vector<1x1x1x80x4xbf16>
    %2 = vector.shape_cast %1 : vector<1x1x1x80x4xbf16> to vector<80x4xbf16>
    %c0_4 = arith.constant 0 : index
    %c0_5 = arith.constant 0 : index
    %c0_6 = arith.constant 0 : index
    %3 = vector.load %arg3[%c0_4, %c0_5, %c0_6] : memref<9x4x128xbf16, #tpu.memory_space<vmem>>, vector<1x4x128xbf16>
    %4 = vector.shape_cast %3 : vector<1x4x128xbf16> to vector<4x128xbf16>
    %cst_7 = arith.constant dense<0.000000e+00> : vector<80x128xf32>
    %5 = tpu.matmul %2, %4, %cst_7 {dimension_numbers = #tpu.dot_dimension_numbers<[1], [0], [0], [1], [0, 0, 1, 1], [], []>} : vector<80x4xbf16>, vector<4x128xbf16>, vector<80x128xf32> -> vector<80x128xf32>
    %6 = arith.addf %0, %5 : vector<80x128xf32>
    %c0_8 = arith.constant 0 : index
    %c0_9 = arith.constant 0 : index
    %c1 = arith.constant 1 : index
    %c0_10 = arith.constant 0 : index
    %c0_11 = arith.constant 0 : index
    %7 = vector.load %arg2[%c0_8, %c0_9, %c1, %c0_10, %c0_11] : memref<1x2x2x92x4xbf16, #tpu.memory_space<vmem>>, vector<1x1x1x80x4xbf16>
    %8 = vector.shape_cast %7 : vector<1x1x1x80x4xbf16> to vector<80x4xbf16>
    %c1_12 = arith.constant 1 : index
    %c0_13 = arith.constant 0 : index
    %c0_14 = arith.constant 0 : index
    %9 = vector.load %arg3[%c1_12, %c0_13, %c0_14] : memref<9x4x128xbf16, #tpu.memory_space<vmem>>, vector<1x4x128xbf16>
    %10 = vector.shape_cast %9 : vector<1x4x128xbf16> to vector<4x128xbf16>
    %cst_15 = arith.constant dense<0.000000e+00> : vector<80x128xf32>
    %11 = tpu.matmul %8, %10, %cst_15 {dimension_numbers = #tpu.dot_dimension_numbers<[1], [0], [0], [1], [0, 0, 1, 1], [], []>} : vector<80x4xbf16>, vector<4x128xbf16>, vector<80x128xf32> -> vector<80x128xf32>
    %12 = arith.addf %6, %11 : vector<80x128xf32>
    %c0_16 = arith.constant 0 : index
    %c0_17 = arith.constant 0 : index
    %c0_18 = arith.constant 0 : index
    %c1_19 = arith.constant 1 : index
    %c0_20 = arith.constant 0 : index
    %13 = vector.load %arg2[%c0_16, %c0_17, %c0_18, %c1_19, %c0_20] : memref<1x2x2x92x4xbf16, #tpu.memory_space<vmem>>, vector<1x1x1x80x4xbf16>
    %14 = vector.shape_cast %13 : vector<1x1x1x80x4xbf16> to vector<80x4xbf16>
    %c2 = arith.constant 2 : index
    %c0_21 = arith.constant 0 : index
    %c0_22 = arith.constant 0 : index
    %15 = vector.load %arg3[%c2, %c0_21, %c0_22] : memref<9x4x128xbf16, #tpu.memory_space<vmem>>, vector<1x4x128xbf16>
    %16 = vector.shape_cast %15 : vector<1x4x128xbf16> to vector<4x128xbf16>
    %cst_23 = arith.constant dense<0.000000e+00> : vector<80x128xf32>
    %17 = tpu.matmul %14, %16, %cst_23 {dimension_numbers = #tpu.dot_dimension_numbers<[1], [0], [0], [1], [0, 0, 1, 1], [], []>} : vector<80x4xbf16>, vector<4x128xbf16>, vector<80x128xf32> -> vector<80x128xf32>
    %18 = arith.addf %12, %17 : vector<80x128xf32>
    %c0_24 = arith.constant 0 : index
    %c1_25 = arith.constant 1 : index
    %c0_26 = arith.constant 0 : index
    %c0_27 = arith.constant 0 : index
    %c0_28 = arith.constant 0 : index
    %19 = vector.load %arg2[%c0_24, %c1_25, %c0_26, %c0_27, %c0_28] : memref<1x2x2x92x4xbf16, #tpu.memory_space<vmem>>, vector<1x1x1x80x4xbf16>
    %20 = vector.shape_cast %19 : vector<1x1x1x80x4xbf16> to vector<80x4xbf16>
    %c3 = arith.constant 3 : index
    %c0_29 = arith.constant 0 : index
    %c0_30 = arith.constant 0 : index
    %21 = vector.load %arg3[%c3, %c0_29, %c0_30] : memref<9x4x128xbf16, #tpu.memory_space<vmem>>, vector<1x4x128xbf16>
    %22 = vector.shape_cast %21 : vector<1x4x128xbf16> to vector<4x128xbf16>
    %cst_31 = arith.constant dense<0.000000e+00> : vector<80x128xf32>
    %23 = tpu.matmul %20, %22, %cst_31 {dimension_numbers = #tpu.dot_dimension_numbers<[1], [0], [0], [1], [0, 0, 1, 1], [], []>} : vector<80x4xbf16>, vector<4x128xbf16>, vector<80x128xf32> -> vector<80x128xf32>
    %24 = arith.addf %18, %23 : vector<80x128xf32>
    %c0_32 = arith.constant 0 : index
    %c1_33 = arith.constant 1 : index
    %c1_34 = arith.constant 1 : index
    %c0_35 = arith.constant 0 : index
    %c0_36 = arith.constant 0 : index
    %25 = vector.load %arg2[%c0_32, %c1_33, %c1_34, %c0_35, %c0_36] : memref<1x2x2x92x4xbf16, #tpu.memory_space<vmem>>, vector<1x1x1x80x4xbf16>
    %26 = vector.shape_cast %25 : vector<1x1x1x80x4xbf16> to vector<80x4xbf16>
    %c4 = arith.constant 4 : index
    %c0_37 = arith.constant 0 : index
    %c0_38 = arith.constant 0 : index
    %27 = vector.load %arg3[%c4, %c0_37, %c0_38] : memref<9x4x128xbf16, #tpu.memory_space<vmem>>, vector<1x4x128xbf16>
    %28 = vector.shape_cast %27 : vector<1x4x128xbf16> to vector<4x128xbf16>
    %cst_39 = arith.constant dense<0.000000e+00> : vector<80x128xf32>
    %29 = tpu.matmul %26, %28, %cst_39 {dimension_numbers = #tpu.dot_dimension_numbers<[1], [0], [0], [1], [0, 0, 1, 1], [], []>} : vector<80x4xbf16>, vector<4x128xbf16>, vector<80x128xf32> -> vector<80x128xf32>
    %30 = arith.addf %24, %29 : vector<80x128xf32>
    %c0_40 = arith.constant 0 : index
    %c1_41 = arith.constant 1 : index
    %c0_42 = arith.constant 0 : index
    %c1_43 = arith.constant 1 : index
    %c0_44 = arith.constant 0 : index
    %31 = vector.load %arg2[%c0_40, %c1_41, %c0_42, %c1_43, %c0_44] : memref<1x2x2x92x4xbf16, #tpu.memory_space<vmem>>, vector<1x1x1x80x4xbf16>
    %32 = vector.shape_cast %31 : vector<1x1x1x80x4xbf16> to vector<80x4xbf16>
    %c5 = arith.constant 5 : index
    %c0_45 = arith.constant 0 : index
    %c0_46 = arith.constant 0 : index
    %33 = vector.load %arg3[%c5, %c0_45, %c0_46] : memref<9x4x128xbf16, #tpu.memory_space<vmem>>, vector<1x4x128xbf16>
    %34 = vector.shape_cast %33 : vector<1x4x128xbf16> to vector<4x128xbf16>
    %cst_47 = arith.constant dense<0.000000e+00> : vector<80x128xf32>
    %35 = tpu.matmul %32, %34, %cst_47 {dimension_numbers = #tpu.dot_dimension_numbers<[1], [0], [0], [1], [0, 0, 1, 1], [], []>} : vector<80x4xbf16>, vector<4x128xbf16>, vector<80x128xf32> -> vector<80x128xf32>
    %36 = arith.addf %30, %35 : vector<80x128xf32>
    %c0_48 = arith.constant 0 : index
    %c0_49 = arith.constant 0 : index
    %c0_50 = arith.constant 0 : index
    %c10 = arith.constant 10 : index
    %c0_51 = arith.constant 0 : index
    %37 = vector.load %arg2[%c0_48, %c0_49, %c0_50, %c10, %c0_51] : memref<1x2x2x92x4xbf16, #tpu.memory_space<vmem>>, vector<1x1x1x80x4xbf16>
    %38 = vector.shape_cast %37 : vector<1x1x1x80x4xbf16> to vector<80x4xbf16>
    %c6 = arith.constant 6 : index
    %c0_52 = arith.constant 0 : index
    %c0_53 = arith.constant 0 : index
    %39 = vector.load %arg3[%c6, %c0_52, %c0_53] : memref<9x4x128xbf16, #tpu.memory_space<vmem>>, vector<1x4x128xbf16>
    %40 = vector.shape_cast %39 : vector<1x4x128xbf16> to vector<4x128xbf16>
    %cst_54 = arith.constant dense<0.000000e+00> : vector<80x128xf32>
    %41 = tpu.matmul %38, %40, %cst_54 {dimension_numbers = #tpu.dot_dimension_numbers<[1], [0], [0], [1], [0, 0, 1, 1], [], []>} : vector<80x4xbf16>, vector<4x128xbf16>, vector<80x128xf32> -> vector<80x128xf32>
    %42 = arith.addf %36, %41 : vector<80x128xf32>
    %c0_55 = arith.constant 0 : index
    %c0_56 = arith.constant 0 : index
    %c1_57 = arith.constant 1 : index
    %c10_58 = arith.constant 10 : index
    %c0_59 = arith.constant 0 : index
    %43 = vector.load %arg2[%c0_55, %c0_56, %c1_57, %c10_58, %c0_59] : memref<1x2x2x92x4xbf16, #tpu.memory_space<vmem>>, vector<1x1x1x80x4xbf16>
    %44 = vector.shape_cast %43 : vector<1x1x1x80x4xbf16> to vector<80x4xbf16>
    %c7 = arith.constant 7 : index
    %c0_60 = arith.constant 0 : index
    %c0_61 = arith.constant 0 : index
    %45 = vector.load %arg3[%c7, %c0_60, %c0_61] : memref<9x4x128xbf16, #tpu.memory_space<vmem>>, vector<1x4x128xbf16>
    %46 = vector.shape_cast %45 : vector<1x4x128xbf16> to vector<4x128xbf16>
    %cst_62 = arith.constant dense<0.000000e+00> : vector<80x128xf32>
    %47 = tpu.matmul %44, %46, %cst_62 {dimension_numbers = #tpu.dot_dimension_numbers<[1], [0], [0], [1], [0, 0, 1, 1], [], []>} : vector<80x4xbf16>, vector<4x128xbf16>, vector<80x128xf32> -> vector<80x128xf32>
    %48 = arith.addf %42, %47 : vector<80x128xf32>
    %c0_63 = arith.constant 0 : index
    %c0_64 = arith.constant 0 : index
    %c0_65 = arith.constant 0 : index
    %c11 = arith.constant 11 : index
    %c0_66 = arith.constant 0 : index
    %49 = vector.load %arg2[%c0_63, %c0_64, %c0_65, %c11, %c0_66] : memref<1x2x2x92x4xbf16, #tpu.memory_space<vmem>>, vector<1x1x1x80x4xbf16>
    %50 = vector.shape_cast %49 : vector<1x1x1x80x4xbf16> to vector<80x4xbf16>
    %c8 = arith.constant 8 : index
    %c0_67 = arith.constant 0 : index
    %c0_68 = arith.constant 0 : index
    %51 = vector.load %arg3[%c8, %c0_67, %c0_68] : memref<9x4x128xbf16, #tpu.memory_space<vmem>>, vector<1x4x128xbf16>
    %52 = vector.shape_cast %51 : vector<1x4x128xbf16> to vector<4x128xbf16>
    %cst_69 = arith.constant dense<0.000000e+00> : vector<80x128xf32>
    %53 = tpu.matmul %50, %52, %cst_69 {dimension_numbers = #tpu.dot_dimension_numbers<[1], [0], [0], [1], [0, 0, 1, 1], [], []>} : vector<80x4xbf16>, vector<4x128xbf16>, vector<80x128xf32> -> vector<80x128xf32>
    %54 = arith.addf %48, %53 : vector<80x128xf32>
    %c0_70 = arith.constant 0 : index
    %c0_71 = arith.constant 0 : index
    %55 = vector.load %arg4[%c0_70, %c0_71] : memref<1x128xf32, #tpu.memory_space<vmem>>, vector<1x128xf32>
    %56 = vector.broadcast %55 : vector<1x128xf32> to vector<80x128xf32>
    %57 = arith.mulf %54, %56 : vector<80x128xf32>
    %c0_72 = arith.constant 0 : index
    %c0_73 = arith.constant 0 : index
    %58 = vector.load %arg5[%c0_72, %c0_73] : memref<1x128xf32, #tpu.memory_space<vmem>>, vector<1x128xf32>
    %59 = vector.broadcast %58 : vector<1x128xf32> to vector<80x128xf32>
    %60 = arith.addf %57, %59 : vector<80x128xf32>
    %cst_74 = arith.constant 0.000000e+00 : f32
    %61 = vector.broadcast %cst_74 : f32 to vector<80x128xf32>
    %62 = arith.maximumf %60, %61 : vector<80x128xf32>
    %c0_75 = arith.constant 0 : index
    %c0_76 = arith.constant 0 : index
    %63 = vector.load %arg6[%c0_75, %c0_76] : memref<80x1xf32, #tpu.memory_space<vmem>>, vector<80x1xf32>
    %64 = vector.broadcast %63 : vector<80x1xf32> to vector<80x128xf32>
    %65 = arith.mulf %62, %64 : vector<80x128xf32>
    %cst_77 = arith.constant 0.000000e+00 : bf16
    %66 = vector.broadcast %cst_77 : bf16 to vector<11x128xbf16>
    %c0_78 = arith.constant 0 : index
    %c0_79 = arith.constant 0 : index
    %c0_80 = arith.constant 0 : index
    %67 = vector.load %arg7[%c0_78, %c0_79, %c0_80] : memref<1x102x128xbf16, #tpu.memory_space<vmem>>, vector<1x11x128xbf16>
    %68 = vector.shape_cast %67 : vector<1x11x128xbf16> to vector<11x128xbf16>
    %69 = vector.shape_cast %66 : vector<11x128xbf16> to vector<1x11x128xbf16>
    tpu.vector_store %arg7[%c0_78, %c0_79, %c0_80], %69 {strides = array<i32>} : memref<1x102x128xbf16, #tpu.memory_space<vmem>>, vector<1x11x128xbf16>,
    %70 = arith.truncf %65 : vector<80x128xf32> to vector<80x128xbf16>
    %c0_81 = arith.constant 0 : index
    %c11_82 = arith.constant 11 : index
    %c0_83 = arith.constant 0 : index
    %71 = vector.load %arg7[%c0_81, %c11_82, %c0_83] : memref<1x102x128xbf16, #tpu.memory_space<vmem>>, vector<1x80x128xbf16>
    %72 = vector.shape_cast %71 : vector<1x80x128xbf16> to vector<80x128xbf16>
    %73 = vector.shape_cast %70 : vector<80x128xbf16> to vector<1x80x128xbf16>
    tpu.vector_store %arg7[%c0_81, %c11_82, %c0_83], %73 {strides = array<i32>} : memref<1x102x128xbf16, #tpu.memory_space<vmem>>, vector<1x80x128xbf16>,
    %c0_84 = arith.constant 0 : index
    %c91 = arith.constant 91 : index
    %c0_85 = arith.constant 0 : index
    %74 = vector.load %arg7[%c0_84, %c91, %c0_85] : memref<1x102x128xbf16, #tpu.memory_space<vmem>>, vector<1x11x128xbf16>
    %75 = vector.shape_cast %74 : vector<1x11x128xbf16> to vector<11x128xbf16>
    %76 = vector.shape_cast %66 : vector<11x128xbf16> to vector<1x11x128xbf16>
    tpu.vector_store %arg7[%c0_84, %c91, %c0_85], %76 {strides = array<i32>} : memref<1x102x128xbf16, #tpu.memory_space<vmem>>, vector<1x11x128xbf16>,
    return
  }
  func.func @transform_0(%arg0: i32, %arg1: i32) -> (i32, i32, i32, i32, i32) {
    %c0_i32 = arith.constant 0 : i32
    %c0_i32_0 = arith.constant 0 : i32
    %c0_i32_1 = arith.constant 0 : i32
    %c0_i32_2 = arith.constant 0 : i32
    %c0_i32_3 = arith.constant 0 : i32
    return %arg0, %c0_i32, %c0_i32_0, %c0_i32_1, %c0_i32_2 : i32, i32, i32, i32, i32
  }
  func.func @transform_1(%arg0: i32, %arg1: i32) -> (i32, i32, i32) {
    %c0_i32 = arith.constant 0 : i32
    %c0_i32_0 = arith.constant 0 : i32
    %c0_i32_1 = arith.constant 0 : i32
    return %c0_i32, %c0_i32_0, %arg1 : i32, i32, i32
  }
  func.func @transform_2(%arg0: i32, %arg1: i32) -> (i32, i32) {
    %c0_i32 = arith.constant 0 : i32
    %c0_i32_0 = arith.constant 0 : i32
    return %c0_i32, %arg1 : i32, i32
  }
  func.func @transform_3(%arg0: i32, %arg1: i32) -> (i32, i32) {
    %c0_i32 = arith.constant 0 : i32
    %c0_i32_0 = arith.constant 0 : i32
    return %c0_i32, %arg1 : i32, i32
  }
  func.func @transform_4(%arg0: i32, %arg1: i32) -> (i32, i32) {
    %c0_i32 = arith.constant 0 : i32
    %c0_i32_0 = arith.constant 0 : i32
    %c0_i32_1 = arith.constant 0 : i32
    return %c0_i32, %c0_i32_0 : i32, i32
  }
  func.func @transform_5(%arg0: i32, %arg1: i32) -> (i32, i32, i32) {
    %c0_i32 = arith.constant 0 : i32
    %c0_i32_0 = arith.constant 0 : i32
    return %arg0, %c0_i32, %arg1 : i32, i32, i32
  }
}

module attributes {stable_mosaic.version = 11 : i64} {
  func.func @_conv2_residual_kernel(%arg0: i32, %arg1: i32, %arg2: memref<1x102x128xbf16, #tpu.memory_space<vmem>>, %arg3: memref<1x1x1x92x4xbf16, #tpu.memory_space<vmem>>, %arg4: memref<9x128x128xbf16, #tpu.memory_space<vmem>>, %arg5: memref<1x128xf32, #tpu.memory_space<vmem>>, %arg6: memref<1x128xf32, #tpu.memory_space<vmem>>, %arg7: memref<4x128xbf16, #tpu.memory_space<vmem>>, %arg8: memref<1x128xf32, #tpu.memory_space<vmem>>, %arg9: memref<1x128xf32, #tpu.memory_space<vmem>>, %arg10: memref<2xf32, #tpu.memory_space<smem>>, %arg11: memref<1x80x128xf32, #tpu.memory_space<vmem>>) attributes {dimension_semantics = [#tpu.dimension_semantics<parallel>, #tpu.dimension_semantics<parallel>], iteration_bounds = array<i64: 2, 1>, scalar_prefetch = 0 : i64, scratch_operands = 0 : i64, tpu.core_type = #tpu.core_type<tc>, window_params = [{transform_indices = @transform_0, window_bounds = array<i64: 1, 102, 128>}, {transform_indices = @transform_1, window_bounds = array<i64: 1, 1, 1, 92, 4>}, {transform_indices = @transform_2, window_bounds = array<i64: 9, 128, 128>}, {transform_indices = @transform_3, window_bounds = array<i64: 1, 128>}, {transform_indices = @transform_4, window_bounds = array<i64: 1, 128>}, {transform_indices = @transform_5, window_bounds = array<i64: 4, 128>}, {transform_indices = @transform_6, window_bounds = array<i64: 1, 128>}, {transform_indices = @transform_7, window_bounds = array<i64: 1, 128>}, {transform_indices = @transform_8, window_bounds = array<i64: 2>}, {transform_indices = @transform_9, window_bounds = array<i64: 1, 80, 128>}]} {
    %cst = arith.constant 0.000000e+00 : f32
    %0 = vector.broadcast %cst : f32 to vector<80x128xf32>
    %c0 = arith.constant 0 : index
    %c0_0 = arith.constant 0 : index
    %c0_1 = arith.constant 0 : index
    %1 = vector.load %arg2[%c0, %c0_0, %c0_1] : memref<1x102x128xbf16, #tpu.memory_space<vmem>>, vector<1x80x128xbf16>
    %2 = vector.shape_cast %1 : vector<1x80x128xbf16> to vector<80x128xbf16>
    %c0_2 = arith.constant 0 : index
    %c0_3 = arith.constant 0 : index
    %c0_4 = arith.constant 0 : index
    %3 = vector.load %arg4[%c0_2, %c0_3, %c0_4] : memref<9x128x128xbf16, #tpu.memory_space<vmem>>, vector<1x128x128xbf16>
    %4 = vector.shape_cast %3 : vector<1x128x128xbf16> to vector<128x128xbf16>
    %cst_5 = arith.constant dense<0.000000e+00> : vector<80x128xf32>
    %5 = tpu.matmul %2, %4, %cst_5 {dimension_numbers = #tpu.dot_dimension_numbers<[1], [0], [0], [1], [0, 0, 1, 1], [], []>} : vector<80x128xbf16>, vector<128x128xbf16>, vector<80x128xf32> -> vector<80x128xf32>
    %6 = arith.addf %0, %5 : vector<80x128xf32>
    %c0_6 = arith.constant 0 : index
    %c1 = arith.constant 1 : index
    %c0_7 = arith.constant 0 : index
    %7 = vector.load %arg2[%c0_6, %c1, %c0_7] : memref<1x102x128xbf16, #tpu.memory_space<vmem>>, vector<1x80x128xbf16>
    %8 = vector.shape_cast %7 : vector<1x80x128xbf16> to vector<80x128xbf16>
    %c1_8 = arith.constant 1 : index
    %c0_9 = arith.constant 0 : index
    %c0_10 = arith.constant 0 : index
    %9 = vector.load %arg4[%c1_8, %c0_9, %c0_10] : memref<9x128x128xbf16, #tpu.memory_space<vmem>>, vector<1x128x128xbf16>
    %10 = vector.shape_cast %9 : vector<1x128x128xbf16> to vector<128x128xbf16>
    %cst_11 = arith.constant dense<0.000000e+00> : vector<80x128xf32>
    %11 = tpu.matmul %8, %10, %cst_11 {dimension_numbers = #tpu.dot_dimension_numbers<[1], [0], [0], [1], [0, 0, 1, 1], [], []>} : vector<80x128xbf16>, vector<128x128xbf16>, vector<80x128xf32> -> vector<80x128xf32>
    %12 = arith.addf %6, %11 : vector<80x128xf32>
    %c0_12 = arith.constant 0 : index
    %c2 = arith.constant 2 : index
    %c0_13 = arith.constant 0 : index
    %13 = vector.load %arg2[%c0_12, %c2, %c0_13] : memref<1x102x128xbf16, #tpu.memory_space<vmem>>, vector<1x80x128xbf16>
    %14 = vector.shape_cast %13 : vector<1x80x128xbf16> to vector<80x128xbf16>
    %c2_14 = arith.constant 2 : index
    %c0_15 = arith.constant 0 : index
    %c0_16 = arith.constant 0 : index
    %15 = vector.load %arg4[%c2_14, %c0_15, %c0_16] : memref<9x128x128xbf16, #tpu.memory_space<vmem>>, vector<1x128x128xbf16>
    %16 = vector.shape_cast %15 : vector<1x128x128xbf16> to vector<128x128xbf16>
    %cst_17 = arith.constant dense<0.000000e+00> : vector<80x128xf32>
    %17 = tpu.matmul %14, %16, %cst_17 {dimension_numbers = #tpu.dot_dimension_numbers<[1], [0], [0], [1], [0, 0, 1, 1], [], []>} : vector<80x128xbf16>, vector<128x128xbf16>, vector<80x128xf32> -> vector<80x128xf32>
    %18 = arith.addf %12, %17 : vector<80x128xf32>
    %c0_18 = arith.constant 0 : index
    %c10 = arith.constant 10 : index
    %c0_19 = arith.constant 0 : index
    %19 = vector.load %arg2[%c0_18, %c10, %c0_19] : memref<1x102x128xbf16, #tpu.memory_space<vmem>>, vector<1x80x128xbf16>
    %20 = vector.shape_cast %19 : vector<1x80x128xbf16> to vector<80x128xbf16>
    %c3 = arith.constant 3 : index
    %c0_20 = arith.constant 0 : index
    %c0_21 = arith.constant 0 : index
    %21 = vector.load %arg4[%c3, %c0_20, %c0_21] : memref<9x128x128xbf16, #tpu.memory_space<vmem>>, vector<1x128x128xbf16>
    %22 = vector.shape_cast %21 : vector<1x128x128xbf16> to vector<128x128xbf16>
    %cst_22 = arith.constant dense<0.000000e+00> : vector<80x128xf32>
    %23 = tpu.matmul %20, %22, %cst_22 {dimension_numbers = #tpu.dot_dimension_numbers<[1], [0], [0], [1], [0, 0, 1, 1], [], []>} : vector<80x128xbf16>, vector<128x128xbf16>, vector<80x128xf32> -> vector<80x128xf32>
    %24 = arith.addf %18, %23 : vector<80x128xf32>
    %c0_23 = arith.constant 0 : index
    %c11 = arith.constant 11 : index
    %c0_24 = arith.constant 0 : index
    %25 = vector.load %arg2[%c0_23, %c11, %c0_24] : memref<1x102x128xbf16, #tpu.memory_space<vmem>>, vector<1x80x128xbf16>
    %26 = vector.shape_cast %25 : vector<1x80x128xbf16> to vector<80x128xbf16>
    %c4 = arith.constant 4 : index
    %c0_25 = arith.constant 0 : index
    %c0_26 = arith.constant 0 : index
    %27 = vector.load %arg4[%c4, %c0_25, %c0_26] : memref<9x128x128xbf16, #tpu.memory_space<vmem>>, vector<1x128x128xbf16>
    %28 = vector.shape_cast %27 : vector<1x128x128xbf16> to vector<128x128xbf16>
    %cst_27 = arith.constant dense<0.000000e+00> : vector<80x128xf32>
    %29 = tpu.matmul %26, %28, %cst_27 {dimension_numbers = #tpu.dot_dimension_numbers<[1], [0], [0], [1], [0, 0, 1, 1], [], []>} : vector<80x128xbf16>, vector<128x128xbf16>, vector<80x128xf32> -> vector<80x128xf32>
    %30 = arith.addf %24, %29 : vector<80x128xf32>
    %c0_28 = arith.constant 0 : index
    %c12 = arith.constant 12 : index
    %c0_29 = arith.constant 0 : index
    %31 = vector.load %arg2[%c0_28, %c12, %c0_29] : memref<1x102x128xbf16, #tpu.memory_space<vmem>>, vector<1x80x128xbf16>
    %32 = vector.shape_cast %31 : vector<1x80x128xbf16> to vector<80x128xbf16>
    %c5 = arith.constant 5 : index
    %c0_30 = arith.constant 0 : index
    %c0_31 = arith.constant 0 : index
    %33 = vector.load %arg4[%c5, %c0_30, %c0_31] : memref<9x128x128xbf16, #tpu.memory_space<vmem>>, vector<1x128x128xbf16>
    %34 = vector.shape_cast %33 : vector<1x128x128xbf16> to vector<128x128xbf16>
    %cst_32 = arith.constant dense<0.000000e+00> : vector<80x128xf32>
    %35 = tpu.matmul %32, %34, %cst_32 {dimension_numbers = #tpu.dot_dimension_numbers<[1], [0], [0], [1], [0, 0, 1, 1], [], []>} : vector<80x128xbf16>, vector<128x128xbf16>, vector<80x128xf32> -> vector<80x128xf32>
    %36 = arith.addf %30, %35 : vector<80x128xf32>
    %c0_33 = arith.constant 0 : index
    %c20 = arith.constant 20 : index
    %c0_34 = arith.constant 0 : index
    %37 = vector.load %arg2[%c0_33, %c20, %c0_34] : memref<1x102x128xbf16, #tpu.memory_space<vmem>>, vector<1x80x128xbf16>
    %38 = vector.shape_cast %37 : vector<1x80x128xbf16> to vector<80x128xbf16>
    %c6 = arith.constant 6 : index
    %c0_35 = arith.constant 0 : index
    %c0_36 = arith.constant 0 : index
    %39 = vector.load %arg4[%c6, %c0_35, %c0_36] : memref<9x128x128xbf16, #tpu.memory_space<vmem>>, vector<1x128x128xbf16>
    %40 = vector.shape_cast %39 : vector<1x128x128xbf16> to vector<128x128xbf16>
    %cst_37 = arith.constant dense<0.000000e+00> : vector<80x128xf32>
    %41 = tpu.matmul %38, %40, %cst_37 {dimension_numbers = #tpu.dot_dimension_numbers<[1], [0], [0], [1], [0, 0, 1, 1], [], []>} : vector<80x128xbf16>, vector<128x128xbf16>, vector<80x128xf32> -> vector<80x128xf32>
    %42 = arith.addf %36, %41 : vector<80x128xf32>
    %c0_38 = arith.constant 0 : index
    %c21 = arith.constant 21 : index
    %c0_39 = arith.constant 0 : index
    %43 = vector.load %arg2[%c0_38, %c21, %c0_39] : memref<1x102x128xbf16, #tpu.memory_space<vmem>>, vector<1x80x128xbf16>
    %44 = vector.shape_cast %43 : vector<1x80x128xbf16> to vector<80x128xbf16>
    %c7 = arith.constant 7 : index
    %c0_40 = arith.constant 0 : index
    %c0_41 = arith.constant 0 : index
    %45 = vector.load %arg4[%c7, %c0_40, %c0_41] : memref<9x128x128xbf16, #tpu.memory_space<vmem>>, vector<1x128x128xbf16>
    %46 = vector.shape_cast %45 : vector<1x128x128xbf16> to vector<128x128xbf16>
    %cst_42 = arith.constant dense<0.000000e+00> : vector<80x128xf32>
    %47 = tpu.matmul %44, %46, %cst_42 {dimension_numbers = #tpu.dot_dimension_numbers<[1], [0], [0], [1], [0, 0, 1, 1], [], []>} : vector<80x128xbf16>, vector<128x128xbf16>, vector<80x128xf32> -> vector<80x128xf32>
    %48 = arith.addf %42, %47 : vector<80x128xf32>
    %c0_43 = arith.constant 0 : index
    %c22 = arith.constant 22 : index
    %c0_44 = arith.constant 0 : index
    %49 = vector.load %arg2[%c0_43, %c22, %c0_44] : memref<1x102x128xbf16, #tpu.memory_space<vmem>>, vector<1x80x128xbf16>
    %50 = vector.shape_cast %49 : vector<1x80x128xbf16> to vector<80x128xbf16>
    %c8 = arith.constant 8 : index
    %c0_45 = arith.constant 0 : index
    %c0_46 = arith.constant 0 : index
    %51 = vector.load %arg4[%c8, %c0_45, %c0_46] : memref<9x128x128xbf16, #tpu.memory_space<vmem>>, vector<1x128x128xbf16>
    %52 = vector.shape_cast %51 : vector<1x128x128xbf16> to vector<128x128xbf16>
    %cst_47 = arith.constant dense<0.000000e+00> : vector<80x128xf32>
    %53 = tpu.matmul %50, %52, %cst_47 {dimension_numbers = #tpu.dot_dimension_numbers<[1], [0], [0], [1], [0, 0, 1, 1], [], []>} : vector<80x128xbf16>, vector<128x128xbf16>, vector<80x128xf32> -> vector<80x128xf32>
    %54 = arith.addf %48, %53 : vector<80x128xf32>
    %c0_48 = arith.constant 0 : index
    %c0_49 = arith.constant 0 : index
    %55 = vector.load %arg5[%c0_48, %c0_49] : memref<1x128xf32, #tpu.memory_space<vmem>>, vector<1x128xf32>
    %56 = vector.broadcast %55 : vector<1x128xf32> to vector<80x128xf32>
    %57 = arith.mulf %54, %56 : vector<80x128xf32>
    %c0_50 = arith.constant 0 : index
    %c0_51 = arith.constant 0 : index
    %58 = vector.load %arg6[%c0_50, %c0_51] : memref<1x128xf32, #tpu.memory_space<vmem>>, vector<1x128xf32>
    %59 = vector.broadcast %58 : vector<1x128xf32> to vector<80x128xf32>
    %60 = arith.addf %57, %59 : vector<80x128xf32>
    %c0_52 = arith.constant 0 : index
    %c0_53 = arith.constant 0 : index
    %c0_54 = arith.constant 0 : index
    %c0_55 = arith.constant 0 : index
    %c0_56 = arith.constant 0 : index
    %61 = vector.load %arg3[%c0_52, %c0_53, %c0_54, %c0_55, %c0_56] : memref<1x1x1x92x4xbf16, #tpu.memory_space<vmem>>, vector<1x1x1x80x4xbf16>
    %62 = vector.shape_cast %61 : vector<1x1x1x80x4xbf16> to vector<80x4xbf16>
    %c0_57 = arith.constant 0 : index
    %c0_58 = arith.constant 0 : index
    %63 = vector.load %arg7[%c0_57, %c0_58] : memref<4x128xbf16, #tpu.memory_space<vmem>>, vector<4x128xbf16>
    %cst_59 = arith.constant dense<0.000000e+00> : vector<80x128xf32>
    %64 = tpu.matmul %62, %63, %cst_59 {dimension_numbers = #tpu.dot_dimension_numbers<[1], [0], [0], [1], [0, 0, 1, 1], [], []>} : vector<80x4xbf16>, vector<4x128xbf16>, vector<80x128xf32> -> vector<80x128xf32>
    %c0_60 = arith.constant 0 : index
    %c0_61 = arith.constant 0 : index
    %65 = vector.load %arg8[%c0_60, %c0_61] : memref<1x128xf32, #tpu.memory_space<vmem>>, vector<1x128xf32>
    %66 = vector.broadcast %65 : vector<1x128xf32> to vector<80x128xf32>
    %67 = arith.mulf %64, %66 : vector<80x128xf32>
    %c0_62 = arith.constant 0 : index
    %c0_63 = arith.constant 0 : index
    %68 = vector.load %arg9[%c0_62, %c0_63] : memref<1x128xf32, #tpu.memory_space<vmem>>, vector<1x128xf32>
    %69 = vector.broadcast %68 : vector<1x128xf32> to vector<80x128xf32>
    %70 = arith.addf %67, %69 : vector<80x128xf32>
    %71 = arith.index_cast %arg0 : i32 to index
    %72 = memref.load %arg10[%71] : memref<2xf32, #tpu.memory_space<smem>>
    %73 = vector.broadcast %72 : f32 to vector<80x128xf32>
    %74 = arith.mulf %60, %73 : vector<80x128xf32>
    %75 = arith.addf %70, %74 : vector<80x128xf32>
    %cst_64 = arith.constant 0.000000e+00 : f32
    %76 = vector.broadcast %cst_64 : f32 to vector<80x128xf32>
    %77 = arith.maximumf %75, %76 : vector<80x128xf32>
    %c0_65 = arith.constant 0 : index
    %c0_66 = arith.constant 0 : index
    %c0_67 = arith.constant 0 : index
    %78 = vector.load %arg11[%c0_65, %c0_66, %c0_67] : memref<1x80x128xf32, #tpu.memory_space<vmem>>, vector<1x80x128xf32>
    %79 = vector.shape_cast %78 : vector<1x80x128xf32> to vector<80x128xf32>
    %80 = vector.shape_cast %77 : vector<80x128xf32> to vector<1x80x128xf32>
    tpu.vector_store %arg11[%c0_65, %c0_66, %c0_67], %80 {strides = array<i32>} : memref<1x80x128xf32, #tpu.memory_space<vmem>>, vector<1x80x128xf32>,
    return
  }
  func.func @transform_0(%arg0: i32, %arg1: i32) -> (i32, i32, i32) {
    %c0_i32 = arith.constant 0 : i32
    %c0_i32_0 = arith.constant 0 : i32
    %c0_i32_1 = arith.constant 0 : i32
    return %arg0, %c0_i32, %c0_i32_0 : i32, i32, i32
  }
  func.func @transform_1(%arg0: i32, %arg1: i32) -> (i32, i32, i32, i32, i32) {
    %c1_i32 = arith.constant 1 : i32
    %c1_i32_0 = arith.constant 1 : i32
    %c0_i32 = arith.constant 0 : i32
    %c0_i32_1 = arith.constant 0 : i32
    %c0_i32_2 = arith.constant 0 : i32
    return %arg0, %c1_i32, %c1_i32_0, %c0_i32, %c0_i32_1 : i32, i32, i32, i32, i32
  }
  func.func @transform_2(%arg0: i32, %arg1: i32) -> (i32, i32, i32) {
    %c0_i32 = arith.constant 0 : i32
    %c0_i32_0 = arith.constant 0 : i32
    %c0_i32_1 = arith.constant 0 : i32
    return %c0_i32, %c0_i32_0, %arg1 : i32, i32, i32
  }
  func.func @transform_3(%arg0: i32, %arg1: i32) -> (i32, i32) {
    %c0_i32 = arith.constant 0 : i32
    %c0_i32_0 = arith.constant 0 : i32
    return %c0_i32, %arg1 : i32, i32
  }
  func.func @transform_4(%arg0: i32, %arg1: i32) -> (i32, i32) {
    %c0_i32 = arith.constant 0 : i32
    %c0_i32_0 = arith.constant 0 : i32
    return %c0_i32, %arg1 : i32, i32
  }
  func.func @transform_5(%arg0: i32, %arg1: i32) -> (i32, i32) {
    %c0_i32 = arith.constant 0 : i32
    %c0_i32_0 = arith.constant 0 : i32
    return %c0_i32, %arg1 : i32, i32
  }
  func.func @transform_6(%arg0: i32, %arg1: i32) -> (i32, i32) {
    %c0_i32 = arith.constant 0 : i32
    %c0_i32_0 = arith.constant 0 : i32
    return %c0_i32, %arg1 : i32, i32
  }
  func.func @transform_7(%arg0: i32, %arg1: i32) -> (i32, i32) {
    %c0_i32 = arith.constant 0 : i32
    %c0_i32_0 = arith.constant 0 : i32
    return %c0_i32, %arg1 : i32, i32
  }
  func.func @transform_8(%arg0: i32, %arg1: i32) -> i32 {
    %c0_i32 = arith.constant 0 : i32
    %c0_i32_0 = arith.constant 0 : i32
    return %c0_i32 : i32
  }
  func.func @transform_9(%arg0: i32, %arg1: i32) -> (i32, i32, i32) {
    %c0_i32 = arith.constant 0 : i32
    %c0_i32_0 = arith.constant 0 : i32
    return %arg0, %c0_i32, %arg1 : i32, i32, i32
  }
}

</mosaic_0001>

<bundles_post_ra>
// kernel: basic_block_forward.2
= control target key start
LH: loop header
LB: loop body
LE: loop exit
PB: predicated region body
PF: predicated region fallthrough
CT: control target
= control target key end

     0   :  { %s2791_s18 = smov 0   ;;  %s2793_s19 = smov 0   ;;  %s3288_s0 = inlined_call_operand.vmem [shape: bf16[2,2,2,92,4], index: 0, kind: input, shape index: {}]   ;;  %s3289_s1 = inlined_call_operand.vmem [shape: bf16[9,4,128], index: 1, kind: input, shape index: {}]   ;;  %s3290_s2 = inlined_call_operand.vmem [shape: f32[1,128], index: 2, kind: input, shape index: {}]   ;;  %s3291_s3 = inlined_call_operand.vmem [shape: f32[1,128], index: 3, kind: input, shape index: {}]   ;;  %s3292_s4 = inlined_call_operand.vmem [shape: f32[80,1], index: 4, kind: input, shape index: {}]   ;;  %s3293_s5 = inlined_call_operand.vmem [shape: bf16[2,102,128], index: 5, kind: output, shape index: {}]  }
   0x1   :  { %s2795_s20 = smov 0  }
   0x2 LB: > { %s27_s21 = sadd.s32 1, %s2752_s19  ;;  %p2077_p0 = scmp.ge.s32.totalorder %s2756_s20, 1  ;;  %s2756_s20 = sphi %s2795_s20, %s15_s20   ;;  %s2752_s19 = sphi %s2793_s19, %s3301_s19   ;;  %s2748_s18 = sphi %s2791_s18, %s3300_s18  }
   0x3   : > { %p29_p1 = scmp.ge.s32.totalorder %s27_s21, 2  ;;  %p226_p2 = scmp.lt.s32.totalorder %s2756_s20, 3 }
   0x5   : > { %s3303_s21 = smov (%p29_p1, %s27_s21), 0  ;;  %p227_p3 = pnand %p2077_p0, %p226_p2 }
   0x6   : > { %vm356_vm0 = vcmask (!%p227_p3), 1041408   ;;  %v2154_v0 = vld [vmem:[%s3289_s1 + $0x8] sm:$0x3] (!%p227_p3)  ;;  %v2090_v1 = vld [vmem:[%s3289_s1 + $0x2] sm:$0x3] (!%p227_p3)  ;;  %v2758_v2 = vmov (!%p227_p3), 0.0  }
   0x7   : > { %230 = sbr.rel (%p227_p3) target bundleno = 443 (0x1bb), region = 40  ;;  %2396 = vmatprep.subr.bf16.mxu0 (!%p227_p3), %v2758_v2  ;;  %2308 = vmatprep.subr.bf16.mxu1 (!%p227_p3), %v2758_v2  ;;  %v2818_v3 = vsel (!%p227_p3), %vm356_vm0, %v2154_v0, 0  ;;  %v358_v4 = vsel (!%p227_p3), %vm356_vm0, %v2090_v1, 0  ;;  %p267_p4 = scmp.lt.s32.totalorder (!%p227_p3), %s2748_s18, 1  ;;  %vm2759_vm1 = vmmov (!%p227_p3), 0   ;;  %vm340_vm2 = vcmask (!%p227_p3), 31744  }
   0x8   : > { %2397 = vmatpush3.bf16.msra.mxu0 (!%p227_p3), %v2818_v3  ;;  %2309 = vmatpush3.bf16.msra.mxu1 (!%p227_p3), %v358_v4  ;;  %v2176_v5 = vld [vmem:[%s3289_s1 + $0xa] sm:$0x3] (!%p227_p3)  ;;  %v301_v6 = vld [vmem:[%s3289_s1] sm:$0x3] (!%p227_p3)  ;;  %vm590_vm3 = vsmask.f32 (!%p227_p3), 7424 }
   0x9   : > { %2310 = vmatprep.mubr.msk.bf16.mxu1 (!%p227_p3), %vm2759_vm1, %v2758_v2  ;;  %2398 = vmatprep.mubr.msk.bf16.mxu0 (!%p227_p3), %vm2759_vm1, %v2758_v2  ;;  %v1115_v9 = vsel (!%p227_p3), %vm356_vm0, %v2176_v5, 0  ;;  %v474_v10 = vsel (!%p227_p3), %vm356_vm0, %v301_v6, 0  ;;  %v2188_v24 = vld [vmem:[%s3289_s1 + $0xc] sm:$0x3] (!%p227_p3)  ;;  %v2111_v35 = vld [vmem:[%s3289_s1 + $0x4] sm:$0x3] (!%p227_p3) }
   0xa   : > { %2418 = vmatprep.subr.bf16.mxu0 (!%p227_p3), %v2758_v2  ;;  %2330 = vmatprep.subr.bf16.mxu1 (!%p227_p3), %v2758_v2  ;;  %v1269_v29 = vsel (!%p227_p3), %vm356_vm0, %v2188_v24, 0  ;;  %v651_v47 = vsel (!%p227_p3), %vm356_vm0, %v2111_v35, 0  ;;  %vm1241_vm4 = vcmask (!%p227_p3), 1046528   ;;  %vm1513_vm5 = vsmask.f32 (!%p227_p3), 6400 }
   0xb   : > { %vm1784_vm6 = vsmask.f32 (!%p227_p3), 1280  ;;  %vm1931_vm8 = vcmask (!%p227_p3), 1043457   ;;  %vm1932_vm9 = vsmask.f32 (!%p227_p3), 7942 }
   0xc   : > { %vm3185_vm7 = vmand (!%p227_p3), %vm356_vm0, %vm1784_vm6  ;;  %vm1819_vm10 = vsmask.f32 (!%p227_p3), 5392 }
   0xd   : > { %vm3215_vm11 = vmand (!%p227_p3), %vm1931_vm8, %vm1932_vm9 }
   0xe   : > { %s3305_s18 = smov (!%p267_p4, %s2748_s18), 1  ;;  %vm3223_vm12 = vmor %vm1784_vm6, %vm1819_vm10 }
   0xf   : > { %s2658_s26 = smul.u32 192, %s3305_s18 }
  0x10   : > { %s2659_s13 = smul.u32 52, %s3305_s18 }
  0x11   : > { %s2837_s6 = scalar_lea.vmem %s3288_s0, %s2658_s26 }
  0x12   : > { %v2689_v7 = vld [vmem:[%s2837_s6 + $0x30] sm:$0xff]   ;;  %v2691_v11 = vld [vmem:[%s2837_s6 + $0x38] sm:$0xff]   ;;  %v2696_v13 = vld [vmem:[%s2837_s6 + $0x60] sm:$0xff]   ;;  %s3000_s23 = scalar_lea.vmem %s3293_s5, %s2659_s13 }
  0x13   : > { %v2690_v8 = vld [vmem:[%s2837_s6 + $0x90] sm:$0xff]   ;;  %2311 = vmatmul.mubr.msk.bf16.vlgmr.msra.gmra.mrb[0].mxu1 %vm340_vm2, %v2689_v7  ;;  %v2692_v12 = vld [vmem:[%s2837_s6 + $0x98] sm:$0xff]   ;;  %v2697_v14 = vld [vmem:[%s2837_s6 + $0x68] sm:$0xff]   ;;  %v1058_v15 = vshll.u32 %v2696_v13, 16  ;;  %v1056_v18 = vshrl.u32 %v2696_v13, 16 }
  0x14   : > { %2399 = vmatmul.mubr.msk.bf16.vlgmr.msra.gmra.mrb[0].mxu0 %vm340_vm2, %v2690_v8  ;;  %2314 = vmatprep.mubr.msk.bf16.mxu1 %vm2759_vm1, %v2758_v2  ;;  %v2693_v16 = vld [vmem:[%s2837_s6 + $0x40] sm:$0xff]   ;;  %v1063_v20 = vshll.u32 %v2697_v14, 16  ;;  %v2699_v23 = vld [vmem:[%s2837_s6 + $0x70] sm:$0xff]   ;;  %v2695_v25 = vld [vmem:[%s2837_s6 + $0x48] sm:$0xff]   ;;  %v1067_v27 = vshrl.u32 %v2697_v14, 16 }
  0x15   : > { %2419 = vmatpush3.bf16.msra.mxu0 %v1115_v9  ;;  %2402 = vmatprep.mubr.msk.bf16.mxu0 %vm2759_vm1, %v2758_v2  ;;  %v2694_v17 = vld [vmem:[%s2837_s6 + $0xa0] sm:$0xff]   ;;  %v1060_v19 = vrot.slane %v1058_v15, 1  ;;  %v1071_v28 = vshll.u32 %v2699_v23, 16  ;;  %v2714_v30 = vld [vmem:[%s2837_s6 + $0x10] sm:$0xff]   ;;  %v2701_v34 = vld [vmem:[%s2837_s6 + $0x78] sm:$0xff]   ;;  %v1075_v39 = vshrl.u32 %v2699_v23, 16 }
  0x16   : > { %2331 = vmatpush3.bf16.msra.mxu1 %v474_v10  ;;  %2440 = vmatprep.subr.bf16.mxu0 %v2758_v2  ;;  %v1065_v22 = vrot.slane %v1063_v20, 1  ;;  %v2698_v31 = vld [vmem:[%s2837_s6 + $0x50] sm:$0xff]   ;;  %v607_v36 = vshll.u32 %v2714_v30, 16  ;;  %v2716_v37 = vld [vmem:[%s2837_s6 + $0x18] sm:$0xff]   ;;  %v2894_v38 = vld [vmem:[%s2837_s6 + $0x80] sm:$0xff]   ;;  %v611_v41 = vshrl.u32 %v2714_v30, 16 }
  0x17   : > { %2352 = vmatprep.subr.bf16.mxu1 %v2758_v2  ;;  %v1061_v21 = vor.u32 %v1060_v19, %v1056_v18  ;;  %v1073_v33 = vrot.slane %v1071_v28, 1  ;;  %v615_v42 = vshll.u32 %v2716_v37, 16  ;;  %v2718_v43 = vld [vmem:[%s2837_s6 + $0x20] sm:$0xff]   ;;  %v1079_v45 = vshll.u32 %v2701_v34, 16  ;;  %v2926_v8 = vld [vmem:[%s2837_s6 + $0x4c] sm:$0xff]   ;;  %v2726_v14 = vld [vmem:[%s2837_s6 + $0x54] sm:$0xff]  }
  0x18   : > { %v1069_v32 = vor.u32 %v1067_v27, %v1065_v22  ;;  %v2896_v40 = vrot.slane %v607_v36, 1  ;;  %v619_v46 = vshrl.u32 %v2716_v37, 16  ;;  %v1087_v50 = vshll.u32 %v2894_v38, 16  ;;  %v2905_v51 = vld [vmem:[%s2837_s6 + $0x4] sm:$0xfe]   ;;  %v2930_v10 = vld [vmem:[%s2837_s6 + $0xc] sm:$0xff]  }
  0x19   : > { %v1066_v26 = vsel %vm590_vm3, %v1061_v21, %v1065_v22  ;;  %v617_v49 = vrot.slane %v615_v42, 1  ;;  %v623_v52 = vshll.u32 %v2718_v43, 16  ;;  %v2911_v53 = vld [vmem:[%s2837_s6 + $0x88] ss:$0 sps:$4 sm:$0x11]   ;;  %v627_v57 = vshrl.u32 %v2718_v43, 16 }
  0x1a   : > { %v1074_v44 = vsel %vm590_vm3, %v1069_v32, %v1073_v33  ;;  %v613_v48 = vor.u32 %v611_v41, %v2896_v40  ;;  %v2721_v56 = vld [vmem:[%s2837_s6 + $0x28] ss:$0 sps:$4 sm:$0x11]   ;;  %v1077_v58 = vor.u32 %v1075_v39, %v1073_v33  ;;  %v1081_v59 = vrot.slane %v1079_v45, 1  ;;  %v2700_v61 = vld [vmem:[%s2837_s6] sm:$0xff]  }
  0x1b   : > { %2315 = vmatmul.mubr.msk.bf16.gmra.mrb[4].mxu1 %vm340_vm2, %v2691_v11  ;;  %v621_v55 = vor.u32 %v619_v46, %v617_v49  ;;  %v625_v60 = vrot.slane %v623_v52, 1  ;;  %v631_v62 = vshll.u32 %v2721_v56, 16  ;;  %v1083_v63 = vshrl.u32 %v2701_v34, 16  ;;  %v2728_v15 = vld [vmem:[%s2837_s6 + $0x5c] ss:$0 sps:$4 sm:$0x11]  }
  0x1c   : > { %2403 = vmatmul.mubr.msk.bf16.gmra.mrb[4].mxu0 %vm340_vm2, %v2692_v12  ;;  %2318 = vmatprep.mubr.msk.bf16.mxu1 %vm2759_vm1, %v2758_v2  ;;  %v2914_v54 = vsel %vm590_vm3, %v613_v48, %v617_v49  ;;  %v1515_v4 = vshrl.u32 %v2905_v51, 16  ;;  %v1089_v5 = vrot.slane %v1087_v50, 1  ;;  %v1091_v6 = vshrl.u32 %v2894_v38, 16  ;;  %v2934_v12 = vld [vmem:[%s2837_s6 + $0x14] sm:$0xff]   ;;  %v2702_v20 = vld [vmem:[%s2837_s6 + $0x8] sm:$0xff]   ;;  %v2950_v21 = vld [vmem:[%s2837_s6 + $0x1c] sm:$0xff]  }
  0x1d   : > { %2406 = vmatprep.mubr.msk.bf16.mxu0 %vm2759_vm1, %v2758_v2  ;;  %v2921_v0 = vsel %vm590_vm3, %v621_v55, %v625_v60  ;;  %v629_v1 = vor.u32 %v627_v57, %v625_v60  ;;  %v633_v7 = vrot.slane %v631_v62, 1  ;;  %v1082_v9 = vsel %vm590_vm3, %v1077_v58, %v1081_v59  ;;  %v2963_v28 = vld [vmem:[%s2837_s6 + $0x24] sm:$0xff]   ;;  %v2733_v49 = vld [vmem:[%s2837_s6 + $0x2c] ss:$0 sps:$4 sm:$0x33]  }
  0x1e   : > { %v1095_v11 = vshll.u32 %v2911_v53, 16  ;;  %v1400_v18 = vrot.slane %v2926_v8, 1  ;;  %v1402_v19 = vrot.slane %v2726_v14, 1  ;;  %v1404_v22 = vrot.slane %v2728_v15, 1  ;;  %v1721_v55 = vld [vmem:[%s3292_s4 + $0x48] sm:$0xff]  ;;  %v2727_v8 = vld [vmem:[%s2837_s6 + $0x70] sm:$0xff]  }
  0x1f   : > { %v2937_v13 = vsel %vm590_vm3, %v629_v1, %v633_v7  ;;  %v1518_v23 = vshll.u32 %v2905_v51, 16  ;;  %v1523_v24 = vshrl.u32 %v2930_v10, 16  ;;  %v1532_v27 = vshrl.u32 %v2934_v12, 16  ;;  %v1713_v56 = vld [vmem:[%s3292_s4 + $0x8] sm:$0xff]  ;;  %v1714_v7 = vld [vmem:[%s3292_s4 + $0x10] sm:$0xff] }
  0x20   : > { %v1535_v32 = vshll.u32 %v2934_v12, 16  ;;  %v1541_v35 = vshrl.u32 %v2950_v21, 16  ;;  %v1544_v36 = vshll.u32 %v2950_v21, 16  ;;  %v1093_v45 = vor.u32 %v1091_v6, %v1089_v5  ;;  %v1712_v6 = vld [vmem:[%s3292_s4] sm:$0xff] }
  0x21   : > { %v1520_v30 = vrot.slane %v1518_v23, 2  ;;  %v1534_v34 = vrot.slane %v1532_v27, 1  ;;  %v1097_v46 = vrot.slane %v1095_v11, 1  ;;  %v1553_v48 = vshll.u32 %v2963_v28, 16  ;;  %v2211_v23 = vld [vmem:[%s3289_s1 + $0xe] sm:$0x3] }
  0x22   : > { %v1537_v39 = vrot.slane %v1535_v32, 2  ;;  %v1543_v42 = vrot.slane %v1541_v35, 1  ;;  %v1546_v43 = vrot.slane %v1544_v36, 2  ;;  %v1562_v60 = vshll.u32 %v2733_v49, 16  ;;  %v1718_v27 = vld [vmem:[%s3292_s4 + $0x30] sm:$0xff]  ;;  %v2709_v35 = vld [vmem:[%s2837_s6 + $0x20] sm:$0xff]  }
  0x23   : > { %2319 = vmatmul.mubr.msk.bf16.gmra.mrb[8].mxu1 %vm340_vm2, %v2693_v16  ;;  %v1517_v16 = vrot.slane %v1515_v4, 1  ;;  %v1555_v58 = vrot.slane %v1553_v48, 2  ;;  %v1249_v48 = vrot.slane %v2963_v28, 1 }
  0x24   : > { %2407 = vmatmul.mubr.msk.bf16.gmra.mrb[8].mxu0 %vm340_vm2, %v2694_v17  ;;  %2322 = vmatprep.mubr.msk.bf16.mxu1 %vm2759_vm1, %v2758_v2  ;;  %v1085_v17 = vor.u32 %v1083_v63, %v1081_v59  ;;  %v1547_v52 = vor.u32 %v1546_v43, %v1543_v42  ;;  %v1559_v59 = vshrl.u32 %v2733_v49, 16  ;;  %v2704_v63 = vld [vmem:[%s2837_s6 + $0x10] sm:$0xff]   ;;  %v2133_v43 = vld [vmem:[%s3289_s1 + $0x6] sm:$0x3] }
  0x25   : > { %2420 = vmatprep.mubr.msk.bf16.mxu0 %vm2759_vm1, %v2758_v2  ;;  %v1521_v38 = vor.u32 %v1520_v30, %v1517_v16  ;;  %v1715_v16 = vld [vmem:[%s3292_s4 + $0x18] sm:$0xff] }
  0x26   : > { %v1090_v37 = vsel %vm590_vm3, %v1085_v17, %v1089_v5  ;;  %v1561_v4 = vrot.slane %v1559_v59, 1  ;;  %v1564_v5 = vrot.slane %v1562_v60, 2  ;;  %v1716_v17 = vld [vmem:[%s3292_s4 + $0x20] sm:$0xff]  ;;  %v1719_v30 = vld [vmem:[%s3292_s4 + $0x38] sm:$0xff]  ;;  %v2223_v60 = vld [vmem:[%s3289_s1 + $0x10] sm:$0x3] }
  0x28   : > { %v1565_v14 = vor.u32 %v1564_v5, %v1561_v4 }
  0x2b   : > { %2323 = vmatmul.mubr.msk.bf16.gmra.mrb[12].mxu1 %vm340_vm2, %v2695_v25  ;;  %v2958_v25 = vsel %vm1241_vm4, %v1400_v18, %v1402_v19 }
  0x2c   : > { %2421 = vmatmul.mubr.msk.bf16.vlgmr.msra.gmra.mrb[0].mxu0 %vm340_vm2, %v1066_v26  ;;  %2326 = vmatprep.mubr.msk.bf16.mxu1 %vm2759_vm1, %v2758_v2  ;;  %v1526_v26 = vshll.u32 %v2930_v10, 16 }
  0x2d   : > { %2441 = vmatpush3.bf16.msra.mxu0 %v1269_v29  ;;  %2424 = vmatprep.mubr.msk.bf16.mxu0 %vm2759_vm1, %v2758_v2  ;;  %v2966_v29 = vsel %vm1241_vm4, %v1402_v19, %v1404_v22  ;;  %v1242_v19 = vrot.slane %v2905_v51, 1  ;;  %v2706_v22 = vld [vmem:[%s2837_s6 + $0x18] sm:$0xff]  }
  0x2e   : > { %2462 = vmatprep.subr.bf16.mxu0 %v2758_v2  ;;  %v1528_v33 = vrot.slane %v1526_v26, 2  ;;  %v2711_v26 = vld [vmem:[%s2837_s6] sm:$0xff]  }
  0x2f   : > { %v594_v32 = vshll.u32 %v2711_v26, 16  ;;  %v592_v36 = vshrl.u32 %v2711_v26, 16 }
  0x33   : > { %2327 = vmatmul.mubr.msk.bf16.gmra.mrb[16].mxu1 %vm340_vm2, %v2698_v31  ;;  %v1525_v31 = vrot.slane %v1523_v24, 1  ;;  %v1717_v24 = vld [vmem:[%s3292_s4 + $0x28] sm:$0xff] }
  0x34   : > { %2425 = vmatmul.mubr.msk.bf16.gmra.mrb[4].mxu0 %vm340_vm2, %v1074_v44  ;;  %2332 = vmatprep.mubr.msk.bf16.mxu1 %vm2759_vm1, %v2758_v2  ;;  %v1550_v44 = vshrl.u32 %v2963_v28, 16 }
  0x35   : > { %2428 = vmatprep.mubr.msk.bf16.mxu0 %vm2759_vm1, %v2758_v2  ;;  %v1529_v41 = vor.u32 %v1528_v33, %v1525_v31  ;;  %v2712_v31 = vld [vmem:[%s2837_s6 + $0x8] sm:$0xff]   ;;  %v1720_v33 = vld [vmem:[%s3292_s4 + $0x40] sm:$0xff] }
  0x36   : > { %v1552_v53 = vrot.slane %v1550_v44, 1 }
  0x37   : > { %v2980_v50 = vsel %vm1513_vm5, %v1521_v38, %v1529_v41  ;;  %v599_v38 = vshll.u32 %v2712_v31, 16 }
  0x38   : > { %v1556_v1 = vor.u32 %v1555_v58, %v1552_v53  ;;  %v2717_v53 = vld [vmem:[%s2837_s6 + $0x2c] ss:$0 sps:$4 sm:$0x11]   ;;  %v2720_v58 = vld [vmem:[%s2837_s6 + $0x3c] sm:$0xff]  }
  0x39   : > { %v601_v42 = vrot.slane %v599_v38, 1  ;;  %v1251_v28 = vrot.slane %v2717_v53, 1  ;;  %v1396_v59 = vrot.slane %v2720_v58, 1 }
  0x3a   : > { %v3013_v11 = vsel %vm1513_vm5, %v1547_v52, %v1556_v1  ;;  %v3017_v15 = vsel %vm1513_vm5, %v1556_v1, %v1565_v14 }
  0x3b   : > { %2333 = vmatmul.mubr.msk.bf16.vlgmr.msra.gmra.mrb[0].mxu1 %vm340_vm2, %v2700_v61  ;;  %v2760_v61 = vmov 0  }
  0x3c   : > { %2429 = vmatmul.mubr.msk.bf16.gmra.mrb[8].mxu0 %vm340_vm2, %v1082_v9  ;;  %2336 = vmatprep.mubr.msk.bf16.mxu1 %vm2759_vm1, %v2758_v2  ;;  %1782 = vst [vmem:[%s3000_s23] sm:$0xf] %v2760_v61  ;;  %1952 = vst [vmem:[%s3000_s23 + $0x30] sm:$0x7] %v2760_v61  ;;  %v1098_v9 = vsel %vm590_vm3, %v1093_v45, %v1097_v46  ;;  %v603_v45 = vshrl.u32 %v2712_v31, 16 }
  0x3d   : > { %2432 = vmatprep.mubr.msk.bf16.mxu0 %vm2759_vm1, %v2758_v2  ;;  %2353 = vmatpush3.bf16.msra.mxu1 %v651_v47  ;;  %v1538_v47 = vor.u32 %v1537_v39, %v1534_v34  ;;  %v1245_v34 = vrot.slane %v2934_v12, 1  ;;  %v1247_v12 = vrot.slane %v2950_v21, 1 }
  0x3e   : > { %2374 = vmatprep.subr.bf16.mxu1 %v2758_v2  ;;  %2687 = vset.pattern.permute.xlu0 %v2760_v61  ;;  %v605_v21 = vor.u32 %v603_v45, %v601_v42 }
  0x3f   : > { %v2992_v57 = vsel %vm1513_vm5, %v1529_v41, %v1538_v47  ;;  %v2995_v62 = vsel %vm1513_vm5, %v1538_v47, %v1547_v52  ;;  %1769 = vperm.xlu0 %2687, %v1721_v55   ;;  %2688 = vset.pattern.permute.xlu1 %v2760_v61  ;;  %v1248_v46 = vsel %vm1241_vm4, %v1245_v34, %v1247_v12  ;;  %v790_v47 = vsel %vm356_vm0, %v2133_v43, 0 }
  0x40   : > { %1729 = vperm.xlu1 %2688, %v1713_v56   ;;  %v610_v49 = vsel %vm590_vm3, %v605_v21, %v2896_v40  ;;  %v1250_v52 = vsel %vm1241_vm4, %v1247_v12, %v1249_v48  ;;  %v1252_v55 = vsel %vm1241_vm4, %v1249_v48, %v1251_v28  ;;  %v2719_v56 = vld [vmem:[%s2837_s6 + $0x34] sm:$0xfe]  }
  0x41   : > { %v1395_v40 = vrot.slane %v2719_v56, 1 }
  0x43   : > { %2337 = vmatmul.mubr.msk.bf16.gmra.mrb[4].mxu1 %vm340_vm2, %v2702_v20  ;;  %1724 = vperm.xlu0 %2687, %v1712_v6   ;;  %v1243_v20 = vrot.slane %v2930_v10, 1  ;;  %v1422_v10 = vsel %vm356_vm0, %v2211_v23, 0  ;;  %v1397_v61 = vsel %vm1241_vm4, %v1395_v40, %v1396_v59 }
  0x44   : > { %2433 = vmatmul.mubr.msk.bf16.gmra.mrb[12].mxu0 %vm340_vm2, %v1090_v37  ;;  %2340 = vmatprep.mubr.msk.bf16.mxu1 %vm2759_vm1, %v2758_v2  ;;  %v596_v37 = vrot.slane %v594_v32, 1 }
  0x45   : > { %2436 = vmatprep.mubr.msk.bf16.mxu0 %vm2759_vm1, %v2758_v2  ;;  %1734 = vperm.xlu1 %2688, %v1714_v7   ;;  %v1244_v51 = vsel %vm1241_vm4, %v1242_v19, %v1243_v20  ;;  %v1246_v39 = vsel %vm1241_vm4, %v1243_v20, %v1245_v34 }
  0x46   : > { %v597_v41 = vor.u32 %v596_v37, %v592_v36 }
  0x47   : > { %1739 = vperm.xlu0 %2687, %v1715_v16  }
  0x48   : > { %v602_v44 = vsel %vm590_vm3, %v597_v41, %v601_v42 }
  0x49   : > { %1744 = vperm.xlu1 %2688, %v1716_v17  }
  0x4b   : > { %2341 = vmatmul.mubr.msk.bf16.gmra.mrb[8].mxu1 %vm340_vm2, %v2704_v63  ;;  %1749 = vperm.xlu0 %2687, %v1717_v24   ;;  %v2722_v63 = vld [vmem:[%s2837_s6 + $0x44] sm:$0xff]   ;;  %v3198_v24 = vld [vmem:[%s3290_s2] ss:$0 sm:$0xff] }
  0x4c   : > { %2437 = vmatmul.mubr.msk.bf16.gmra.mrb[16].mxu0 %vm340_vm2, %v1098_v9  ;;  %2344 = vmatprep.mubr.msk.bf16.mxu1 %vm2759_vm1, %v2758_v2  ;;  %v1398_v1 = vrot.slane %v2722_v63, 1 }
  0x4d   : > { %2442 = vmatprep.mubr.msk.bf16.mxu0 %vm2759_vm1, %v2758_v2  ;;  %1754 = vperm.xlu1 %2688, %v1718_v27  }
  0x4e   : > { %v1399_v4 = vsel %vm1241_vm4, %v1396_v59, %v1398_v1  ;;  %v1401_v5 = vsel %vm1241_vm4, %v1398_v1, %v1400_v18  ;;  %v2730_v18 = vld [vmem:[%s2837_s6 + $0x80] sm:$0xff]  }
  0x4f   : > { %1759 = vperm.xlu0 %2687, %v1719_v30   ;;  %v3205_v30 = vld [vmem:[%s3291_s3] ss:$0 sm:$0xff] }
  0x51   : > { %1764 = vperm.xlu1 %2688, %v1720_v33  }
  0x53   : > { %2345 = vmatmul.mubr.msk.bf16.gmra.mrb[12].mxu1 %vm340_vm2, %v2706_v22 }
  0x54   : > { %2443 = vmatmul.mubr.msk.bf16.vlgmr.msra.gmra.mrb[0].mxu0 %vm340_vm2, %v1244_v51  ;;  %2348 = vmatprep.mubr.msk.bf16.mxu1 %vm2759_vm1, %v2758_v2 }
  0x55   : > { %2463 = vmatpush3.bf16.msra.mxu0 %v1422_v10  ;;  %2446 = vmatprep.mubr.msk.bf16.mxu0 %vm2759_vm1, %v2758_v2 }
  0x56   : > { %2484 = vmatprep.subr.bf16.mxu0 %v2758_v2 }
  0x5b   : > { %2349 = vmatmul.mubr.msk.bf16.gmra.mrb[16].mxu1 %vm340_vm2, %v2709_v35 }
  0x5c   : > { %2447 = vmatmul.mubr.msk.bf16.gmra.mrb[4].mxu0 %vm340_vm2, %v1246_v39  ;;  %2354 = vmatprep.mubr.msk.bf16.mxu1 %vm2759_vm1, %v2758_v2 }
  0x5d   : > { %2450 = vmatprep.mubr.msk.bf16.mxu0 %vm2759_vm1, %v2758_v2 }
  0x63   : > { %2355 = vmatmul.mubr.msk.bf16.vlgmr.msra.gmra.mrb[0].mxu1 %vm340_vm2, %v602_v44 }
  0x64   : > { %2451 = vmatmul.mubr.msk.bf16.gmra.mrb[8].mxu0 %vm340_vm2, %v1248_v46  ;;  %2358 = vmatprep.mubr.msk.bf16.mxu1 %vm2759_vm1, %v2758_v2 }
  0x65   : > { %2454 = vmatprep.mubr.msk.bf16.mxu0 %vm2759_vm1, %v2758_v2  ;;  %2375 = vmatpush3.bf16.msra.mxu1 %v790_v47 }
  0x66   : > { %2506 = vmatprep.subr.bf16.mxu1 %v2758_v2 }
  0x6b   : > { %2359 = vmatmul.mubr.msk.bf16.gmra.mrb[4].mxu1 %vm340_vm2, %v610_v49 }
  0x6c   : > { %2455 = vmatmul.mubr.msk.bf16.gmra.mrb[12].mxu0 %vm340_vm2, %v1250_v52  ;;  %2362 = vmatprep.mubr.msk.bf16.mxu1 %vm2759_vm1, %v2758_v2 }
  0x6d   : > { %2458 = vmatprep.mubr.msk.bf16.mxu0 %vm2759_vm1, %v2758_v2 }
  0x73   : > { %2363 = vmatmul.mubr.msk.bf16.gmra.mrb[8].mxu1 %vm340_vm2, %v2914_v54  ;;  %v1583_v54 = vsel %vm356_vm0, %v2223_v60, 0 }
  0x74   : > { %2459 = vmatmul.mubr.msk.bf16.gmra.mrb[16].mxu0 %vm340_vm2, %v1252_v55  ;;  %2366 = vmatprep.mubr.msk.bf16.mxu1 %vm2759_vm1, %v2758_v2 }
  0x75   : > { %2464 = vmatprep.mubr.msk.bf16.mxu0 %vm2759_vm1, %v2758_v2 }
  0x7b   : > { %2367 = vmatmul.mubr.msk.bf16.gmra.mrb[12].mxu1 %vm340_vm2, %v2921_v0  ;;  %v2723_v0 = vld [vmem:[%s2837_s6 + $0x60] sm:$0xff]  }
  0x7c   : > { %2465 = vmatmul.mubr.msk.bf16.vlgmr.msra.gmra.mrb[0].mxu0 %vm340_vm2, %v1397_v61  ;;  %2370 = vmatprep.mubr.msk.bf16.mxu1 %vm2759_vm1, %v2758_v2 }
  0x7d   : > { %2485 = vmatpush3.bf16.msra.mxu0 %v1583_v54  ;;  %2468 = vmatprep.mubr.msk.bf16.mxu0 %vm2759_vm1, %v2758_v2 }
  0x83   : > { %2371 = vmatmul.mubr.msk.bf16.gmra.mrb[16].mxu1 %vm340_vm2, %v2937_v13  ;;  %v2725_v13 = vld [vmem:[%s2837_s6 + $0x68] sm:$0xff]  }
  0x84   : > { %2469 = vmatmul.mubr.msk.bf16.gmra.mrb[4].mxu0 %vm340_vm2, %v1399_v4  ;;  %2376 = vmatprep.mubr.msk.bf16.mxu1 %vm2759_vm1, %v2758_v2 }
  0x85   : > { %2472 = vmatprep.mubr.msk.bf16.mxu0 %vm2759_vm1, %v2758_v2 }
  0x8b   : > { %2377 = vmatmul.mubr.msk.bf16.vlgmr.msra.gmra.mrb[0].mxu1 %vm340_vm2, %v2723_v0 }
  0x8c   : > { %2473 = vmatmul.mubr.msk.bf16.gmra.mrb[8].mxu0 %vm340_vm2, %v1401_v5  ;;  %2380 = vmatprep.mubr.msk.bf16.mxu1 %vm2759_vm1, %v2758_v2 }
  0x8d   : > { %2476 = vmatprep.mubr.msk.bf16.mxu0 %vm2759_vm1, %v2758_v2  ;;  %2507 = vmatpush3.bf16.msra.mxu1 %v2818_v3  ;;  %v2729_v3 = vld [vmem:[%s2837_s6 + $0x78] sm:$0xff]  }
  0x93   : > { %2381 = vmatmul.mubr.msk.bf16.gmra.mrb[4].mxu1 %vm340_vm2, %v2725_v13 }
  0x94   : > { %2477 = vmatmul.mubr.msk.bf16.gmra.mrb[12].mxu0 %vm340_vm2, %v2958_v25  ;;  %2384 = vmatprep.mubr.msk.bf16.mxu1 %vm2759_vm1, %v2758_v2  ;;  %v2731_v25 = vld [vmem:[%s2837_s6 + $0xa8] sm:$0xff]  }
  0x95   : > { %2480 = vmatprep.mubr.msk.bf16.mxu0 %vm2759_vm1, %v2758_v2 }
  0x9b   : > { %2385 = vmatmul.mubr.msk.bf16.gmra.mrb[8].mxu1 %vm340_vm2, %v2727_v8 }
  0x9c   : > { %2481 = vmatmul.mubr.msk.bf16.gmra.mrb[16].mxu0 %vm340_vm2, %v2966_v29  ;;  %2388 = vmatprep.mubr.msk.bf16.mxu1 %vm2759_vm1, %v2758_v2  ;;  %v2732_v29 = vld [vmem:[%s2837_s6 + $0xb0] sm:$0xff]  }
  0x9d   : > { %2486 = vmatprep.mubr.msk.bf16.mxu0 %vm2759_vm1, %v2758_v2 }
  0xa3   : > { %2389 = vmatmul.mubr.msk.bf16.gmra.mrb[12].mxu1 %vm340_vm2, %v2729_v3 }
  0xa4   : > { %2487 = vmatmul.mubr.msk.bf16.vlgmr.msra.gmra.mrb[0].mxu0 %vm340_vm2, %v2980_v50  ;;  %2392 = vmatprep.mubr.msk.bf16.mxu1 %vm2759_vm1, %v2758_v2 }
  0xa5   : > { %2490 = vmatprep.mubr.msk.bf16.mxu0 %vm2759_vm1, %v2758_v2 }
  0xab   : > { %2393 = vmatmul.mubr.msk.bf16.gmra.mrb[16].mxu1 %vm340_vm2, %v2730_v18 }
  0xac   : > { %2491 = vmatmul.mubr.msk.bf16.gmra.mrb[4].mxu0 %vm340_vm2, %v2992_v57  ;;  %2410 = vmatprep.mubr.msk.bf16.mxu1 %vm2759_vm1, %v2758_v2  ;;  %v1786_v57 = vld [vmem:[%s3000_s23 + $0x4] sm:$0x3] }
  0xad   : > { %2494 = vmatprep.mubr.msk.bf16.mxu0 %vm2759_vm1, %v2758_v2 }
  0xb3   : > { %2411 = vmatmul.mubr.msk.bf16.vlgmr.msra.gmra.mrb[12].mxu1 %vm340_vm2, %v2731_v25 }
  0xb4   : > { %2495 = vmatmul.mubr.msk.bf16.gmra.mrb[8].mxu0 %vm340_vm2, %v2995_v62  ;;  %2414 = vmatprep.mubr.msk.bf16.mxu1 %vm2759_vm1, %v2758_v2  ;;  %v1787_v62 = vsel %vm3185_vm7, 0, %v1786_v57 }
  0xb5   : > { %2498 = vmatprep.mubr.msk.bf16.mxu0 %vm2759_vm1, %v2758_v2  ;;  %1788 = vst [vmem:[%s3000_s23 + $0x4] sm:$0x3] %v1787_v62 }
  0xbb   : > { %2415 = vmatmul.mubr.msk.bf16.gmra.mrb[16].mxu1 %vm340_vm2, %v2732_v29 }
  0xbc   : > { %2499 = vmatmul.mubr.msk.bf16.gmra.mrb[12].mxu0 %vm340_vm2, %v3013_v11  ;;  %v1934_v4 = vld [vmem:[%s3000_s23 + $0x4] sm:$0xe] }
  0xbd   : > { %2502 = vmatprep.mubr.msk.bf16.mxu0 %vm2759_vm1, %v2758_v2 }
  0xbe   : > { %v3200_v26 = vpop.permute.xlu0 %1769 }
  0xbf   : > { %v1730_v41 = vpop.permute.xlu1 %1729 }
  0xc2   : > { %v1725_v36 = vpop.permute.xlu0 %1724 }
  0xc4   : > { %2503 = vmatmul.mubr.msk.bf16.gmra.mrb[16].mxu0 %vm340_vm2, %v3017_v15  ;;  %v1735_v56 = vpop.permute.xlu1 %1734 }
  0xc6   : > { %v1740_v54 = vpop.permute.xlu0 %1739 }
 0x15e   : > { %v826_v6 = vpop.f32.mrb[0].mxu1 }
 0x15f   : > { %v2378_v7 = vpop.f32.mrb[1].mxu1 }
 0x160   : > { %v829_v9 = vpop.f32.mrb[2].mxu1 }
 0x161   : > { %v2379_v11 = vpop.f32.mrb[3].mxu1 }
 0x166   : > { %v834_v2 = vpop.f32.mrb[4].mxu1 }
 0x167   : > { %v2382_v14 = vpop.f32.mrb[5].mxu1 }
 0x168   : > { %v837_v16 = vpop.f32.mrb[6].mxu1 }
 0x169   : > { %v2383_v15 = vpop.f32.mrb[7].mxu1 }
 0x16e   : > { %v842_v17 = vpop.f32.mrb[8].mxu1 }
 0x16f   : > { %v2386_v19 = vpop.f32.mrb[9].mxu1 }
 0x170   : > { %v3193_v20 = vpop.f32.mrb[10].mxu1 }
 0x171   : > { %v2387_v22 = vpop.f32.mrb[11].mxu1 }
 0x177   : > { %v1619_v23 = vpop.f32.mrb[0].mxu0 }
 0x178   : > { %v2508_v27 = vadd.f32 %v1619_v23, %v826_v6  ;;  %v2488_v51 = vpop.f32.mrb[1].mxu0 }
 0x179   : > { %v1622_v10 = vpop.f32.mrb[2].mxu0 }
 0x17a   : > { %v1675_v31 = vmul.f32 %v2508_v27, %v3198_v24  ;;  %v2509_v32 = vadd.f32 %v1622_v10, %v829_v9  ;;  %v2489_v33 = vpop.f32.mrb[3].mxu0 }
 0x17c   : > { %v1676_v34 = vmul.f32 %v2509_v32, %v3198_v24  ;;  %v1692_v35 = vadd.f32 %v3205_v30, %v1675_v31 }
 0x17e   : > { %v1702_v37 = vmax.f32 %v1692_v35, 0.0  ;;  %v1693_v38 = vadd.f32 %v3205_v30, %v1676_v34  ;;  %v1745_v35 = vpop.permute.xlu1 %1744 }
 0x17f   : > { %v1627_v39 = vpop.f32.mrb[4].mxu0 }
 0x180   : > { %v1772_v42 = vmul.f32 %v1725_v36, %v1702_v37  ;;  %v2510_v12 = vadd.f32 %v1627_v39, %v834_v2  ;;  %v2492_v43 = vpop.f32.mrb[5].mxu0  ;;  %v1703_v44 = vmax.f32 %v1693_v38, 0.0  ;;  %v1750_v38 = vpop.permute.xlu0 %1749 }
 0x181   : > { %v1630_v45 = vpop.f32.mrb[6].mxu0 }
 0x182   : > { %v2244_v46 = vpack.c.bf16 %v1772_v42, %v1772_v42  ;;  %v1677_v47 = vmul.f32 %v2510_v12, %v3198_v24  ;;  %v1773_v21 = vmul.f32 %v1730_v41, %v1703_v44  ;;  %v2511_v48 = vadd.f32 %v1630_v45, %v837_v16  ;;  %v2493_v49 = vpop.f32.mrb[7].mxu0 }
 0x184   : > { %v1822_v52 = vshrl.u32 %v2244_v46, 16  ;;  %v1825_v53 = vshll.u32 %v2244_v46, 16  ;;  %v2245_v28 = vpack.c.bf16 %v1773_v21, %v1773_v21  ;;  %v1678_v55 = vmul.f32 %v2511_v48, %v3198_v24 }
 0x185   : > { %v1694_v58 = vadd.f32 %v3205_v30, %v1677_v47 }
 0x186   : > { %v1824_v40 = vrot.slane %v1822_v52, 6  ;;  %v1827_v59 = vrot.slane %v1825_v53, 7  ;;  %v1831_v60 = vshrl.u32 %v2245_v28, 16  ;;  %v1834_v61 = vshll.u32 %v2245_v28, 16  ;;  %v989_v63 = vpop.f32.mrb[12].mxu1 }
 0x187   : > { %v1704_v0 = vmax.f32 %v1694_v58, 0.0  ;;  %v1635_v5 = vpop.f32.mrb[8].mxu0  ;;  %v2412_v13 = vpop.f32.mrb[13].mxu1  ;;  %v1695_v8 = vadd.f32 %v3205_v30, %v1678_v55 }
 0x188   : > { %v1828_v3 = vor.u32 %v1827_v59, %v1824_v40  ;;  %v1833_v18 = vrot.slane %v1831_v60, 6  ;;  %v1836_v25 = vrot.slane %v1834_v61, 7  ;;  %v2512_v29 = vadd.f32 %v1635_v5, %v842_v17  ;;  %v2496_v57 = vpop.f32.mrb[9].mxu0  ;;  %v992_v62 = vpop.f32.mrb[14].mxu1 }
 0x189   : > { %v1774_v7 = vmul.f32 %v1735_v56, %v1704_v0  ;;  %v1705_v9 = vmax.f32 %v1695_v8, 0.0  ;;  %v1638_v11 = vpop.f32.mrb[10].mxu0  ;;  %v2413_v2 = vpop.f32.mrb[15].mxu1 }
 0x18a   : > { %v1829_v14 = vrot.slane %v1828_v3, 4  ;;  %v1935_v16 = vsel %vm3215_vm11, %v1828_v3, %v1934_v4  ;;  %v1837_v15 = vor.u32 %v1836_v25, %v1833_v18  ;;  %v1679_v17 = vmul.f32 %v2512_v29, %v3198_v24  ;;  %v2497_v19 = vpop.f32.mrb[11].mxu0  ;;  %v1755_v57 = vpop.permute.xlu1 %1754 }
 0x18b   : > { %1936 = vst [vmem:[%s3000_s23 + $0x4] sm:$0xe] %v1935_v16  ;;  %v2246_v22 = vpack.c.bf16 %v1774_v7, %v1774_v7  ;;  %v1775_v23 = vmul.f32 %v1740_v54, %v1705_v9  ;;  %v2513_v27 = vadd.f32 %v1638_v11, %v3193_v20  ;;  %v1760_v19 = vpop.permute.xlu0 %1759 }
 0x18c   : > { %v1838_v51 = vsel %vm3223_vm12, %v1829_v14, %v1837_v15  ;;  %v1696_v10 = vadd.f32 %v3205_v30, %v1679_v17  ;;  %v1839_v48 = vrot.slane %v1837_v15, 4 }
 0x18d   : > { %1937 = vst [vmem:[%s3000_s23 + $0x8] sm:$0xf] %v1838_v51  ;;  %v1841_v31 = vshrl.u32 %v2246_v22, 16  ;;  %v1844_v32 = vshll.u32 %v2246_v22, 16  ;;  %v2247_v33 = vpack.c.bf16 %v1775_v23, %v1775_v23  ;;  %v1680_v34 = vmul.f32 %v2513_v27, %v3198_v24 }
 0x18e   : > { %v1706_v36 = vmax.f32 %v1696_v10, 0.0  ;;  %v997_v37 = vpop.f32.mrb[16].mxu1 }
 0x18f   : > { %v1843_v39 = vrot.slane %v1841_v31, 6  ;;  %v1846_v41 = vrot.slane %v1844_v32, 7  ;;  %v1851_v42 = vshrl.u32 %v2247_v33, 16  ;;  %v1854_v12 = vshll.u32 %v2247_v33, 16  ;;  %v1643_v20 = vpop.f32.mrb[12].mxu0  ;;  %v2416_v43 = vpop.f32.mrb[17].mxu1 }
 0x190   : > { %v1776_v44 = vmul.f32 %v1745_v35, %v1706_v36  ;;  %v2514_v45 = vadd.f32 %v1643_v20, %v989_v63  ;;  %v2500_v46 = vpop.f32.mrb[13].mxu0  ;;  %v1697_v47 = vadd.f32 %v3205_v30, %v1680_v34  ;;  %v1000_v21 = vpop.f32.mrb[18].mxu1 }
 0x191   : > { %v1847_v49 = vor.u32 %v1846_v41, %v1843_v39  ;;  %v1853_v52 = vrot.slane %v1851_v42, 6  ;;  %v1856_v53 = vrot.slane %v1854_v12, 7  ;;  %v1646_v28 = vpop.f32.mrb[14].mxu0  ;;  %v2417_v55 = vpop.f32.mrb[19].mxu1 }
 0x192   : > { %v2248_v56 = vpack.c.bf16 %v1776_v44, %v1776_v44  ;;  %v1681_v58 = vmul.f32 %v2514_v45, %v3198_v24  ;;  %v1707_v40 = vmax.f32 %v1697_v47, 0.0  ;;  %v2515_v59 = vadd.f32 %v1646_v28, %v992_v62  ;;  %v2501_v60 = vpop.f32.mrb[15].mxu0 }
 0x193   : > { %v1848_v61 = vsel %vm3223_vm12, %v1839_v48, %v1847_v49  ;;  %v1849_v63 = vrot.slane %v1847_v49, 4  ;;  %v1857_v54 = vor.u32 %v1856_v53, %v1853_v52 }
 0x194   : > { %1938 = vst [vmem:[%s3000_s23 + $0xc] sm:$0xf] %v1848_v61  ;;  %v1861_v4 = vshrl.u32 %v2248_v56, 16  ;;  %v1864_v0 = vshll.u32 %v2248_v56, 16  ;;  %v1777_v5 = vmul.f32 %v1750_v38, %v1707_v40  ;;  %v1682_v13 = vmul.f32 %v2515_v59, %v3198_v24 }
 0x195   : > { %v1858_v8 = vsel %vm3223_vm12, %v1849_v63, %v1857_v54  ;;  %v1698_v3 = vadd.f32 %v3205_v30, %v1681_v58  ;;  %v1859_v7 = vrot.slane %v1857_v54, 4 }
 0x196   : > { %1939 = vst [vmem:[%s3000_s23 + $0x10] sm:$0xf] %v1858_v8  ;;  %v1863_v18 = vrot.slane %v1861_v4, 6  ;;  %v1866_v25 = vrot.slane %v1864_v0, 7  ;;  %v2249_v29 = vpack.c.bf16 %v1777_v5, %v1777_v5  ;;  %v1699_v62 = vadd.f32 %v3205_v30, %v1682_v13 }
 0x197   : > { %v1708_v9 = vmax.f32 %v1698_v3, 0.0  ;;  %v1651_v11 = vpop.f32.mrb[16].mxu0 }
 0x198   : > { %v1867_v2 = vor.u32 %v1866_v25, %v1863_v18  ;;  %v1871_v14 = vshrl.u32 %v2249_v29, 16  ;;  %v1874_v16 = vshll.u32 %v2249_v29, 16  ;;  %v2516_v15 = vadd.f32 %v1651_v11, %v997_v37  ;;  %v2504_v17 = vpop.f32.mrb[17].mxu0 }
 0x199   : > { %v1778_v22 = vmul.f32 %v1755_v57, %v1708_v9  ;;  %v1709_v23 = vmax.f32 %v1699_v62, 0.0  ;;  %v1654_v27 = vpop.f32.mrb[18].mxu0 }
 0x19a   : > { %v1868_v51 = vsel %vm3223_vm12, %v1859_v7, %v1867_v2  ;;  %v1869_v10 = vrot.slane %v1867_v2, 4  ;;  %v1873_v31 = vrot.slane %v1871_v14, 6  ;;  %v1876_v32 = vrot.slane %v1874_v16, 7  ;;  %v2505_v33 = vpop.f32.mrb[19].mxu0  ;;  %v1946_v7 = vld [vmem:[%s3000_s23 + $0x2c] sm:$0x3] }
 0x19b   : > { %1940 = vst [vmem:[%s3000_s23 + $0x14] sm:$0xf] %v1868_v51  ;;  %v2250_v34 = vpack.c.bf16 %v1778_v22, %v1778_v22  ;;  %v1683_v35 = vmul.f32 %v2516_v15, %v3198_v24  ;;  %v1779_v36 = vmul.f32 %v1760_v19, %v1709_v23  ;;  %v2517_v38 = vadd.f32 %v1654_v27, %v1000_v21 }
 0x19c   : > { %v1877_v37 = vor.u32 %v1876_v32, %v1873_v31 }
 0x19d   : > { %v1881_v39 = vshrl.u32 %v2250_v34, 16  ;;  %v1884_v41 = vshll.u32 %v2250_v34, 16  ;;  %v2251_v42 = vpack.c.bf16 %v1779_v36, %v1779_v36  ;;  %v1684_v12 = vmul.f32 %v2517_v38, %v3198_v24  ;;  %v1765_v24 = vpop.permute.xlu1 %1764 }
 0x19e   : > { %v1878_v20 = vsel %vm3223_vm12, %v1869_v10, %v1877_v37  ;;  %v1700_v43 = vadd.f32 %v3205_v30, %v1683_v35  ;;  %v1879_v49 = vrot.slane %v1877_v37, 4 }
 0x19f   : > { %1941 = vst [vmem:[%s3000_s23 + $0x18] sm:$0xf] %v1878_v20  ;;  %v1883_v44 = vrot.slane %v1881_v39, 6  ;;  %v1886_v45 = vrot.slane %v1884_v41, 7  ;;  %v1891_v46 = vshrl.u32 %v2251_v42, 16  ;;  %v1894_v47 = vshll.u32 %v2251_v42, 16 }
 0x1a0   : > { %v1701_v48 = vadd.f32 %v3205_v30, %v1684_v12  ;;  %v1710_v21 = vmax.f32 %v1700_v43, 0.0 }
 0x1a1   : > { %v1887_v52 = vor.u32 %v1886_v45, %v1883_v44  ;;  %v1893_v53 = vrot.slane %v1891_v46, 6  ;;  %v1896_v28 = vrot.slane %v1894_v47, 7 }
 0x1a2   : > { %v1711_v55 = vmax.f32 %v1701_v48, 0.0  ;;  %v1780_v56 = vmul.f32 %v1765_v24, %v1710_v21 }
 0x1a3   : > { %v1888_v58 = vsel %vm3223_vm12, %v1879_v49, %v1887_v52  ;;  %v1889_v40 = vrot.slane %v1887_v52, 4  ;;  %v1897_v59 = vor.u32 %v1896_v28, %v1893_v53 }
 0x1a4   : > { %1942 = vst [vmem:[%s3000_s23 + $0x1c] sm:$0xf] %v1888_v58  ;;  %v1781_v60 = vmul.f32 %v3200_v26, %v1711_v55  ;;  %v2252_v61 = vpack.c.bf16 %v1780_v56, %v1780_v56 }
 0x1a5   : > { %v1898_v30 = vsel %vm3223_vm12, %v1889_v40, %v1897_v59  ;;  %v1899_v3 = vrot.slane %v1897_v59, 4 }
 0x1a6   : > { %1943 = vst [vmem:[%s3000_s23 + $0x20] sm:$0xf] %v1898_v30  ;;  %v2253_v63 = vpack.c.bf16 %v1781_v60, %v1781_v60  ;;  %v1901_v54 = vshrl.u32 %v2252_v61, 16  ;;  %v1904_v4 = vshll.u32 %v2252_v61, 16 }
 0x1a8   : > { %v1911_v0 = vshrl.u32 %v2253_v63, 16  ;;  %v1914_v5 = vshll.u32 %v2253_v63, 16  ;;  %v1903_v13 = vrot.slane %v1901_v54, 6  ;;  %v1906_v8 = vrot.slane %v1904_v4, 7 }
 0x1aa   : > { %v1913_v26 = vrot.slane %v1911_v0, 6  ;;  %v1916_v18 = vrot.slane %v1914_v5, 7  ;;  %v1907_v25 = vor.u32 %v1906_v8, %v1903_v13 }
 0x1ac   : > { %v1917_v29 = vor.u32 %v1916_v18, %v1913_v26  ;;  %v1908_v57 = vsel %vm3223_vm12, %v1899_v3, %v1907_v25  ;;  %v1909_v62 = vrot.slane %v1907_v25, 4 }
 0x1ad   : > { %1944 = vst [vmem:[%s3000_s23 + $0x24] sm:$0xf] %v1908_v57 }
 0x1ae   : > { %v1919_v9 = vrot.slane %v1917_v29, 4  ;;  %v1918_v11 = vsel %vm3223_vm12, %v1909_v62, %v1917_v29 }
 0x1af   : > { %1945 = vst [vmem:[%s3000_s23 + $0x28] sm:$0xf] %v1918_v11 }
 0x1b0   : > { %v1947_v2 = vsel %vm3185_vm7, %v1919_v9, %v1946_v7 }
 0x1b1   : > { %1948 = vst [vmem:[%s3000_s23 + $0x2c] sm:$0x3] %v1947_v2 }
 0x1b8   : > { %v1949_v14 = vld [vmem:[%s3000_s23 + $0x2c] sm:$0xe] }
 0x1b9   : > { %v1950_v16 = vsel %vm3215_vm11, 0, %v1949_v14 }
 0x1ba   : > { %1951 = vst [vmem:[%s3000_s23 + $0x2c] sm:$0xe] %v1950_v16 }
 0x1bb PF: > { %s15_s20 = sadd.s32 1, %s2756_s20   ;;  %s3300_s18 = smov %s2752_s19 }
 0x1bc   : > { %p12_p5 = scmp.ge.s32.totalorder %s15_s20, 4   ;;  %s3301_s19 = smov %s3303_s21 }
 0x1be   :  { %14 = sbr.rel (!%p12_p5) target bundleno = 2 (0x2), region = 90 }

// kernel: basic_block_forward.3
= control target key start
LH: loop header
LB: loop body
LE: loop exit
PB: predicated region body
PF: predicated region fallthrough
CT: control target
= control target key end

     0   :  { %14 = vsyncpa [#allocation3], 0  ;;  %s3729_s30 = smov 0   ;;  %s3731_s10 = smov 0   ;;  %s4520_s0 = inlined_call_operand.vmem [shape: bf16[2,102,128], index: 0, kind: input, shape index: {}]   ;;  %s4521_s1 = inlined_call_operand.vmem [shape: bf16[2,2,2,92,4], index: 1, kind: input, shape index: {}]   ;;  %s4522_s2 = inlined_call_operand.vmem [shape: bf16[9,128,128], index: 2, kind: input, shape index: {}]   ;;  %s4523_s3 = inlined_call_operand.vmem [shape: f32[1,128], index: 3, kind: input, shape index: {}]   ;;  %s4524_s4 = inlined_call_operand.vmem [shape: f32[1,128], index: 4, kind: input, shape index: {}]   ;;  %s4525_s5 = inlined_call_operand.vmem [shape: bf16[4,128], index: 5, kind: input, shape index: {}]   ;;  %s4526_s6 = inlined_call_operand.vmem [shape: f32[1,128], index: 6, kind: input, shape index: {}]   ;;  %s4527_s7 = inlined_call_operand.vmem [shape: f32[1,128], index: 7, kind: input, shape index: {}]   ;;  %s4528_s8 = inlined_call_operand.vmem [shape: f32[2], index: 8, kind: input, shape index: {}]   ;;  %s4529_s9 = inlined_call_operand.vmem [shape: f32[2,80,128], index: 9, kind: output, shape index: {}]  }
   0x1   :  { %s3733_s11 = smov 0  }
   0x2 LB: > { %s2610_s12 = sadd.s32 4294967295, %s3674_s11   ;;  %s32_s13 = sadd.s32 1, %s3670_s10  ;;  %s3674_s11 = sphi %s3733_s11, %s20_s11   ;;  %s3670_s10 = sphi %s3731_s10, %s4533_s10   ;;  %s3666_s30 = sphi %s3729_s30, %s4532_s30  }
   0x3   : > { %p34_p0 = scmp.ge.s32.totalorder %s32_s13, 2  ;;  %p2612_p1 = scmp.ge.s32.totalorder %s3674_s11, 1 }
   0x4   : > { %p294_p2 = scmp.lt.s32.totalorder %s3674_s11, 3  ;;  %p3754_p4 = scmp.eq.s32.totalorder %s2610_s12, 0 }
   0x5   : > { %s4535_s13 = smov (%p34_p0, %s32_s13), 0  ;;  %s345_s18 = sshll.u32 %s4528_s8, 4  ;;  %s346_s18 = int_to_ptr.vmem [resolvable:$true] %s345_s18 }
   0x6   : > { %p3750_p3 = pnand %p2612_p1, %p294_p2  ;;  %s3633_s19 = scalar_lea.vmem %s346_s18, 16 }
   0x7   : > { %p3634_p7 = scmp.ne.s32.totalorder %s346_s18, %s3633_s19  ;;  %p3641_p11 = scmp.lt.s32.totalorder %s346_s18, %s346_s18 }
   0x8   : > { %p3500_p5 = pneg %p3750_p3  ;;  %p3642_p12 = scmp.lt.s32.totalorder %s3633_s19, %s3633_s19 }
   0xa   : > { %p3501_p6 = pnand %p3754_p4, %p3500_p5  ;;  %p3643_p13 = por %p3642_p12, %p3641_p11 }
   0xc   : > { %p3635_p8 = pneg %p3501_p6 }
   0xe   : > { %p3636_p9 = pnand %p3635_p8, %p3634_p7 }
  0x10   : > { %p3637_p10 = pneg %p3636_p9 }
  0x12   : > { %p3644_p0 = pnand %p3643_p13, %p3637_p10 }
  0x14   : > { %3647 = shalt.err (!%p3644_p0)
}
  0x15   : > { %s3676_s20 = smov [#allocation2]   ;;  %375 = sbr.rel (%p3750_p3) target bundleno = 484 (0x1e4), region = 56 }
  0x16   : > { %3503 = dma.vmem_to_smem (!%p3501_p6), %s346_s18, 16, %s3676_s20, [#allocation3]  }
  0x1c   : > { %3661 = dma.done.wait (%p3754_p4), [#allocation3], 16  }
  0x1d   : > { %3663 = vsyncadd (%p3754_p4), [#allocation3], 4294967280 }
  0x1e   : > { %381 = sfence }
  0x1f   : > { %v3533_v0 = vld [vmem:[%s4522_s2 + $0x40] sm:$0xff]   ;;  %v3677_v1 = vmov 0.0   ;;  %v3535_v3 = vld [vmem:[%s4522_s2 + $0x48] sm:$0xff]   ;;  %vm3678_vm0 = vmmov 0   ;;  %p441_p1 = scmp.lt.s32.totalorder %s3666_s30, 1  ;;  %v3537_v5 = vld [vmem:[%s4522_s2 + $0x50] sm:$0xff]  }
  0x20   : > { %2998 = vmatprep.subr.bf16.mxu1 %v3677_v1  ;;  %3142 = vmatprep.subr.bf16.mxu0 %v3677_v1  ;;  %v3534_v2 = vld [vmem:[%s4522_s2 + $0x100] sm:$0xff]   ;;  %v3536_v4 = vld [vmem:[%s4522_s2 + $0x108] sm:$0xff]   ;;  %v3538_v6 = vld [vmem:[%s4522_s2 + $0x110] sm:$0xff]   ;;  %vm553_vm1 = vsmask.f32 7424  ;;  %vm871_vm3 = vcmask 1046528  }
  0x21   : > { %2999 = vmatpush3.bf16.msra.mxu1 %v3533_v0  ;;  %3014 = vmatprep.mubr.msk.bf16.mxu1 %vm3678_vm0, %v3677_v1  ;;  %s3793_s29 = scalar_select %p441_p1, %s3666_s30, 1  ;;  %v3539_v7 = vld [vmem:[%s4522_s2 + $0x58] sm:$0xff]   ;;  %v3541_v9 = vld [vmem:[%s4522_s2 + $0x60] sm:$0xff]   ;;  %v3543_v11 = vld [vmem:[%s4522_s2 + $0x68] sm:$0xff]   ;;  %vm1243_vm2 = vsmask.f32 6400 }
  0x22   : > { %3143 = vmatpush3.bf16.msra.mxu0 %v3534_v2  ;;  %3000 = vmatprep.subr.bf16.mxu1 %v3677_v1  ;;  %v3540_v8 = vld [vmem:[%s4522_s2 + $0x118] sm:$0xff]   ;;  %v3542_v10 = vld [vmem:[%s4522_s2 + $0x120] sm:$0xff]   ;;  %v3544_v19 = vld [vmem:[%s4522_s2 + $0x128] sm:$0xff]   ;;  %vm1454_vm4 = vcmask 1045504   ;;  %vm2037_vm5 = vcmask 1044480   ;;  %vm2271_vm7 = vcmask 1041408  }
  0x23   : > { %3144 = vmatprep.subr.bf16.mxu0 %v3677_v1  ;;  %3158 = vmatprep.mubr.msk.bf16.mxu0 %vm3678_vm0, %v3677_v1  ;;  %s3494_s17 = smul.u32 52, %s3793_s29  ;;  %v3545_v22 = vld [vmem:[%s4522_s2 + $0x70] sm:$0xff]   ;;  %v3547_v35 = vld [vmem:[%s4522_s2 + $0x78] sm:$0xff]   ;;  %v3553_v45 = vld [vmem:[%s4522_s2 + $0x140] sm:$0xff]   ;;  %vm1826_vm6 = vsmask.f32 5376 }
  0x24   : > { %v3546_v25 = vld [vmem:[%s4522_s2 + $0x130] sm:$0xff]   ;;  %v3548_v36 = vld [vmem:[%s4522_s2 + $0x138] sm:$0xff]   ;;  %v3554_v47 = vld [vmem:[%s4522_s2] sm:$0xff]   ;;  %s2624_s19 = smul.u32 192, %s3793_s29  ;;  %vm2255_vm8 = vcmask 31744  }
  0x25   : > { %3001 = vmatpush3.bf16.msra.mxu1 %v3535_v3  ;;  %s3815_s24 = scalar_lea.vmem %s4520_s0, %s3494_s17  ;;  %v3555_v54 = vld [vmem:[%s4522_s2 + $0x148] sm:$0xff]   ;;  %v3559_v62 = vld [vmem:[%s4522_s2 + $0x150] sm:$0xff]   ;;  %s3495_s18 = smul.u32 80, %s3793_s29 }
  0x26   : > { %3145 = vmatpush3.bf16.msra.mxu0 %v3536_v4  ;;  %3002 = vmatprep.subr.bf16.mxu1 %v3677_v1  ;;  %v481_v12 = vld [vmem:[%s3815_s24] sm:$0xf]  ;;  %v3830_v13 = vld [vmem:[%s3815_s24 + $0x4] sm:$0xf]  ;;  %v3836_v15 = vld [vmem:[%s3815_s24 + $0x8] sm:$0xff]   ;;  %s4130_s12 = scalar_lea.vmem %s4521_s1, %s2624_s19 }
  0x27   : > { %3146 = vmatprep.subr.bf16.mxu0 %v3677_v1  ;;  %v3833_v14 = vcombine.low %v481_v12, %v3830_v13  ;;  %v3839_v16 = vld [vmem:[%s3815_s24 + $0xc] sm:$0xff]   ;;  %v1019_v17 = vld [vmem:[%s3815_s24 + $0x4] sm:$0xe]  ;;  %v3843_v18 = vld [vmem:[%s3815_s24 + $0x8] sm:$0xf]  ;;  %v562_v30 = vshll.u32 %v3836_v15, 16  ;;  %s4454_s29 = scalar_lea.vmem %s4529_s9, %s3495_s18 }
  0x28   : > { %v3851_v21 = vcombine.low %v1019_v17, %v3843_v18  ;;  %v1253_v23 = vshrl.u32 %v3839_v16, 16  ;;  %v1256_v24 = vshll.u32 %v3839_v16, 16  ;;  %v3875_v37 = vld [vmem:[%s3815_s24 + $0x10] sm:$0xff]   ;;  %v566_v48 = vshrl.u32 %v3836_v15, 16  ;;  %v3896_v53 = vld [vmem:[%s3815_s24 + $0x1c] sm:$0xff]   ;;  %v3558_v55 = vld [vmem:[%s4522_s2 + $0x8] sm:$0xff]  }
  0x29   : > { %3003 = vmatpush3.bf16.msra.mxu1 %v3537_v5  ;;  %v557_v20 = vshll.u32 %v3833_v14, 16  ;;  %v555_v26 = vshrl.u32 %v3833_v14, 16  ;;  %v564_v39 = vrot.slane %v562_v30, 1  ;;  %v3878_v40 = vld [vmem:[%s3815_s24 + $0x14] sm:$0xff]   ;;  %v570_v49 = vshll.u32 %v3875_v37, 16 }
  0x2a   : > { %3147 = vmatpush3.bf16.msra.mxu0 %v3538_v6  ;;  %3004 = vmatprep.subr.bf16.mxu1 %v3677_v1  ;;  %v1245_v27 = vshrl.u32 %v3851_v21, 16  ;;  %v1248_v28 = vshll.u32 %v3851_v21, 16  ;;  %v1255_v33 = vrot.slane %v1253_v23, 1  ;;  %v1258_v34 = vrot.slane %v1256_v24, 2  ;;  %v3906_v58 = vld [vmem:[%s3815_s24 + $0x18] sm:$0xff]   ;;  %v3560_v4 = vld [vmem:[%s4522_s2 + $0x10] sm:$0xff]  }
  0x2b   : > { %3148 = vmatprep.subr.bf16.mxu0 %v3677_v1  ;;  %v559_v29 = vrot.slane %v557_v20, 1  ;;  %v1262_v43 = vshrl.u32 %v3878_v40, 16  ;;  %v1265_v44 = vshll.u32 %v3878_v40, 16  ;;  %v568_v56 = vor.u32 %v566_v48, %v564_v39  ;;  %v3563_v12 = vld [vmem:[%s4522_s2 + $0x158] sm:$0xff]  }
  0x2c   : > { %v1247_v31 = vrot.slane %v1245_v27, 1  ;;  %v1250_v32 = vrot.slane %v1248_v28, 2  ;;  %v1259_v42 = vor.u32 %v1258_v34, %v1255_v33  ;;  %v572_v57 = vrot.slane %v570_v49, 1  ;;  %v3564_v17 = vld [vmem:[%s4522_s2 + $0x18] sm:$0xff]  }
  0x2d   : > { %3005 = vmatpush3.bf16.msra.mxu1 %v3539_v7  ;;  %v560_v38 = vor.u32 %v559_v29, %v555_v26  ;;  %v1264_v50 = vrot.slane %v1262_v43, 1  ;;  %v1267_v52 = vrot.slane %v1265_v44, 2  ;;  %v1271_v60 = vshrl.u32 %v3896_v53, 16  ;;  %v3928_v7 = vld [vmem:[%s3815_s24 + $0x24] sm:$0xff]  }
  0x2e   : > { %3149 = vmatpush3.bf16.msra.mxu0 %v3540_v8  ;;  %3006 = vmatprep.subr.bf16.mxu1 %v3677_v1  ;;  %v1251_v41 = vor.u32 %v1250_v32, %v1247_v31  ;;  %v1274_v61 = vshll.u32 %v3896_v53, 16  ;;  %v573_v63 = vsel %vm553_vm1, %v568_v56, %v572_v57  ;;  %v574_v0 = vshrl.u32 %v3875_v37, 16  ;;  %v3955_v26 = vld [vmem:[%s3815_s24 + $0x2c] ss:$0 sps:$4 sm:$0x33]   ;;  %v3568_v31 = vld [vmem:[%s4522_s2 + $0x20] sm:$0xff]  }
  0x2f   : > { %3150 = vmatprep.subr.bf16.mxu0 %v3677_v1  ;;  %v565_v46 = vsel %vm553_vm1, %v560_v38, %v564_v39  ;;  %v1268_v59 = vor.u32 %v1267_v52, %v1264_v50  ;;  %v578_v2 = vshll.u32 %v3906_v58, 16  ;;  %v1273_v5 = vrot.slane %v1271_v60, 1  ;;  %v3959_v30 = vld [vmem:[%s3815_s24 + $0x28] ss:$0 sps:$4 sm:$0x11]  }
  0x30   : > { %v1260_v51 = vsel %vm1243_vm2, %v1251_v41, %v1259_v42  ;;  %v1276_v6 = vrot.slane %v1274_v61, 2  ;;  %v576_v8 = vor.u32 %v574_v0, %v572_v57  ;;  %v1283_v20 = vshll.u32 %v3928_v7, 16  ;;  %v3569_v32 = vld [vmem:[%s4522_s2 + $0x168] sm:$0xff]   ;;  %v1433_v57 = vld [vmem:[%s3815_s24 + $0x4] sm:$0xc] }
  0x31   : > { %3007 = vmatpush3.bf16.msra.mxu1 %v3541_v9  ;;  %v1269_v3 = vsel %vm1243_vm2, %v1259_v42, %v1268_v59  ;;  %v580_v9 = vrot.slane %v578_v2, 1  ;;  %v582_v23 = vshrl.u32 %v3906_v58, 16  ;;  %v1289_v38 = vshrl.u32 %v3955_v26, 16 }
  0x32   : > { %3151 = vmatpush3.bf16.msra.mxu0 %v3542_v10  ;;  %3008 = vmatprep.subr.bf16.mxu1 %v3677_v1  ;;  %v3934_v10 = vld [vmem:[%s3815_s24 + $0x20] sm:$0xff]   ;;  %v1285_v29 = vrot.slane %v1283_v20, 2  ;;  %v1292_v39 = vshll.u32 %v3955_v26, 16  ;;  %v873_v41 = vrot.slane %v3836_v15, 1  ;;  %v875_v42 = vrot.slane %v3875_v37, 1 }
  0x33   : > { %3152 = vmatprep.subr.bf16.mxu0 %v3677_v1  ;;  %v581_v24 = vsel %vm553_vm1, %v576_v8, %v580_v9  ;;  %v584_v33 = vor.u32 %v582_v23, %v580_v9  ;;  %v594_v43 = vshll.u32 %v3959_v30, 16  ;;  %v1291_v49 = vrot.slane %v1289_v38, 1  ;;  %v850_v8 = vld [vmem:[%s3815_s24] sm:$0xe]  ;;  %v3580_v23 = vld [vmem:[%s4522_s2 + $0x188] sm:$0xff]  }
  0x34   : > { %v1294_v50 = vrot.slane %v1292_v39, 2  ;;  %v1075_v52 = vrot.slane %v3851_v21, 1  ;;  %v3575_v21 = vld [vmem:[%s4522_s2 + $0x178] sm:$0xff]   ;;  %v1078_v61 = vrot.slane %v3878_v40, 1  ;;  %v1082_v2 = vrot.slane %v3928_v7, 1  ;;  %v3591_v39 = vld [vmem:[%s4522_s2 + $0xb0] sm:$0xff]  }
  0x35   : > { %3009 = vmatpush3.bf16.msra.mxu1 %v3543_v11  ;;  %v1277_v11 = vor.u32 %v1276_v6, %v1273_v5  ;;  %v2760_v6 = vcombine.low %v1433_v57, %v3843_v18  ;;  %v1464_v38 = vrot.slane %v3955_v26, 2  ;;  %v4134_v26 = vld [vmem:[%s3815_s24 + $0x18] sm:$0xff]  }
  0x36   : > { %3153 = vmatpush3.bf16.msra.mxu0 %v3544_v19  ;;  %3010 = vmatprep.subr.bf16.mxu1 %v3677_v1  ;;  %v1280_v19 = vshrl.u32 %v3928_v7, 16 }
  0x37   : > { %3154 = vmatprep.subr.bf16.mxu0 %v3677_v1  ;;  %v1278_v27 = vsel %vm1243_vm2, %v1268_v59, %v1277_v11  ;;  %v1295_v59 = vor.u32 %v1294_v50, %v1291_v49  ;;  %v1455_v18 = vrot.slane %v2760_v6, 2  ;;  %v4143_v49 = vld [vmem:[%s3815_s24 + $0x20] sm:$0xff]  }
  0x38   : > { %v1282_v28 = vrot.slane %v1280_v19, 1  ;;  %v2043_v57 = vrot.slane %v4143_v49, 3 }
  0x39   : > { %3011 = vmatpush3.bf16.msra.mxu1 %v3545_v22  ;;  %v3565_v22 = vld [vmem:[%s4522_s2 + $0x160] sm:$0xff]  }
  0x3a   : > { %3155 = vmatpush3.bf16.msra.mxu0 %v3546_v25  ;;  %3012 = vmatprep.subr.bf16.mxu1 %v3677_v1  ;;  %v586_v25 = vshll.u32 %v3934_v10, 16 }
  0x3b   : > { %3156 = vmatprep.subr.bf16.mxu0 %v3677_v1 }
  0x3c   : > { %v588_v34 = vrot.slane %v586_v25, 1 }
  0x3d   : > { %3013 = vmatpush3.bf16.msra.mxu1 %v3547_v35  ;;  %v3570_v35 = vld [vmem:[%s4522_s2 + $0x28] sm:$0xff]  }
  0x3e   : > { %3157 = vmatpush3.bf16.msra.mxu0 %v3548_v36  ;;  %3034 = vmatprep.subr.bf16.mxu1 %v3677_v1  ;;  %v1286_v36 = vor.u32 %v1285_v29, %v1282_v28  ;;  %v589_v44 = vsel %vm553_vm1, %v584_v33, %v588_v34  ;;  %v1460_v28 = vrot.slane %v3896_v53, 2  ;;  %v3585_v29 = vld [vmem:[%s4522_s2 + $0x98] sm:$0xff]   ;;  %v3588_v33 = vld [vmem:[%s4522_s2 + $0x1a8] sm:$0xff]  }
  0x3f   : > { %3178 = vmatprep.subr.bf16.mxu0 %v3677_v1 }
  0x40   : > { %3015 = vmatmul.mubr.bf16.vlgmr.msra.gmra.mrb[0].mxu1 %v565_v46  ;;  %v590_v46 = vshrl.u32 %v3934_v10, 16  ;;  %v1287_v48 = vsel %vm1243_vm2, %v1277_v11, %v1286_v36  ;;  %v1296_v5 = vsel %vm1243_vm2, %v1286_v36, %v1295_v59  ;;  %v2680_v11 = vcombine.low %v850_v8, %v3830_v13  ;;  %v3579_v13 = vld [vmem:[%s4522_s2 + $0x80] sm:$0xff]   ;;  %v3624_v36 = vld [vmem:[%s3815_s24 + $0x2c] ss:$0 sps:$4 sm:$0x11]   ;;  %v3593_v59 = vld [vmem:[%s4522_s2 + $0xb8] sm:$0xff]  }
  0x41   : > { %3159 = vmatmul.mubr.bf16.vlgmr.msra.gmra.mrb[0].mxu0 %v1260_v51  ;;  %3035 = vmatpush3.bf16.msra.mxu1 %v3554_v47  ;;  %v3991_v47 = vsel %vm871_vm3, %v873_v41, %v875_v42  ;;  %v3574_v51 = vld [vmem:[%s4522_s2 + $0x30] sm:$0xff]  }
  0x42   : > { %3179 = vmatpush3.bf16.msra.mxu0 %v3553_v45  ;;  %3018 = vmatprep.mubr.msk.bf16.mxu1 %vm3678_vm0, %v3677_v1  ;;  %v3571_v45 = vld [vmem:[%s4522_s2 + $0x170] sm:$0xff]   ;;  %v592_v56 = vor.u32 %v590_v46, %v588_v34  ;;  %v3589_v34 = vld [vmem:[%s4522_s2 + $0xa8] sm:$0xff]  }
  0x43   : > { %3180 = vmatprep.subr.bf16.mxu0 %v3677_v1  ;;  %3162 = vmatprep.mubr.msk.bf16.mxu0 %vm3678_vm0, %v3677_v1  ;;  %v2016_v46 = vld [vmem:[%s3815_s24 + $0x8] sm:$0x8] }
  0x44   : > { %3036 = vmatprep.subr.bf16.mxu1 %v3677_v1 }
  0x45   : > { %3037 = vmatpush3.bf16.msra.mxu1 %v3558_v55  ;;  %v1076_v55 = vrot.slane %v3839_v16, 1 }
  0x46   : > { %3181 = vmatpush3.bf16.msra.mxu0 %v3555_v54  ;;  %3038 = vmatprep.subr.bf16.mxu1 %v3677_v1  ;;  %v596_v54 = vrot.slane %v594_v43, 1 }
  0x47   : > { %3182 = vmatprep.subr.bf16.mxu0 %v3677_v1  ;;  %v4010_v60 = vsel %vm871_vm3, %v1075_v52, %v1076_v55  ;;  %v4020_v0 = vsel %vm871_vm3, %v1076_v55, %v1078_v61  ;;  %v4155_v55 = vld [vmem:[%s3815_s24 + $0x28] sm:$0xff]  }
  0x48   : > { %3019 = vmatmul.mubr.bf16.gmra.mrb[4].mxu1 %v573_v63  ;;  %v1080_v63 = vrot.slane %v3896_v53, 1  ;;  %v3586_v53 = vld [vmem:[%s4522_s2 + $0x1a0] sm:$0xff]  }
  0x49   : > { %3163 = vmatmul.mubr.bf16.gmra.mrb[4].mxu0 %v1269_v3  ;;  %3022 = vmatprep.mubr.msk.bf16.mxu1 %vm3678_vm0, %v3677_v1  ;;  %v597_v3 = vsel %vm553_vm1, %v592_v56, %v596_v54  ;;  %v1602_v54 = vld [vmem:[%s3815_s24 + $0x8] sm:$0xc]  ;;  %v2041_v56 = vrot.slane %v4134_v26, 3 }
  0x4a   : > { %3183 = vmatpush3.bf16.msra.mxu0 %v3559_v62  ;;  %3039 = vmatpush3.bf16.msra.mxu1 %v3560_v4  ;;  %v3576_v62 = vld [vmem:[%s4522_s2 + $0x38] sm:$0xff]   ;;  %v4025_v4 = vsel %vm871_vm3, %v1078_v61, %v1080_v63  ;;  %v4033_v9 = vsel %vm871_vm3, %v1080_v63, %v1082_v2  ;;  %v2045_v61 = vrot.slane %v4155_v55, 3 }
  0x4b   : > { %3166 = vmatprep.mubr.msk.bf16.mxu0 %vm3678_vm0, %v3677_v1  ;;  %3184 = vmatprep.subr.bf16.mxu0 %v3677_v1  ;;  %v4174_v63 = vsel %vm2037_vm5, %v2041_v56, %v2043_v57 }
  0x4c   : > { %3040 = vmatprep.subr.bf16.mxu1 %v3677_v1 }
  0x4e   : > { %3185 = vmatpush3.bf16.msra.mxu0 %v3563_v12  ;;  %3041 = vmatpush3.bf16.msra.mxu1 %v3564_v17  ;;  %v872_v12 = vrot.slane %v2680_v11, 1  ;;  %v1456_v17 = vrot.slane %v3839_v16, 2  ;;  %v3581_v16 = vld [vmem:[%s4522_s2 + $0x88] sm:$0xff]   ;;  %v3598_v11 = vld [vmem:[%s4522_s2 + $0xc0] sm:$0xff]  }
  0x4f   : > { %3186 = vmatprep.subr.bf16.mxu0 %v3677_v1  ;;  %3042 = vmatprep.subr.bf16.mxu1 %v3677_v1 }
  0x50   : > { %3023 = vmatmul.mubr.bf16.gmra.mrb[8].mxu1 %v581_v24  ;;  %v4044_v19 = vsel %vm871_vm3, %v872_v12, %v873_v41  ;;  %v1457_v20 = vsel %vm1454_vm4, %v1455_v18, %v1456_v17  ;;  %v1458_v24 = vrot.slane %v3878_v40, 2  ;;  %v3583_v40 = vld [vmem:[%s4522_s2 + $0x90] sm:$0xff]   ;;  %v1603_v41 = vld [vmem:[%s3815_s24 + $0xc] sm:$0xf]  ;;  %v3597_v18 = vld [vmem:[%s4522_s2 + $0x1c0] sm:$0xff]  }
  0x51   : > { %3167 = vmatmul.mubr.bf16.gmra.mrb[8].mxu0 %v1278_v27  ;;  %3026 = vmatprep.mubr.msk.bf16.mxu1 %vm3678_vm0, %v3677_v1  ;;  %v3584_v27 = vld [vmem:[%s4522_s2 + $0x198] sm:$0xff]  }
  0x52   : > { %3187 = vmatpush3.bf16.msra.mxu0 %v3565_v22  ;;  %3170 = vmatprep.mubr.msk.bf16.mxu0 %vm3678_vm0, %v3677_v1  ;;  %v3578_v22 = vld [vmem:[%s4522_s2 + $0x180] sm:$0xff]   ;;  %v1459_v25 = vsel %vm1454_vm4, %v1456_v17, %v1458_v24  ;;  %v3601_v17 = vld [vmem:[%s4522_s2 + $0xc8] sm:$0xff]  }
  0x53   : > { %3043 = vmatpush3.bf16.msra.mxu1 %v3568_v31  ;;  %3188 = vmatprep.subr.bf16.mxu0 %v3677_v1  ;;  %v3587_v31 = vld [vmem:[%s4522_s2 + $0xa0] sm:$0xff]  }
  0x54   : > { %3044 = vmatprep.subr.bf16.mxu1 %v3677_v1 }
  0x56   : > { %3189 = vmatpush3.bf16.msra.mxu0 %v3569_v32  ;;  %v1462_v32 = vrot.slane %v3928_v7, 2 }
  0x57   : > { %3045 = vmatpush3.bf16.msra.mxu1 %v3570_v35  ;;  %3190 = vmatprep.subr.bf16.mxu0 %v3677_v1  ;;  %v3590_v35 = vld [vmem:[%s4522_s2 + $0x1b0] sm:$0xff]  }
  0x58   : > { %3027 = vmatmul.mubr.bf16.gmra.mrb[12].mxu1 %v589_v44  ;;  %3046 = vmatprep.subr.bf16.mxu1 %v3677_v1  ;;  %v1463_v43 = vsel %vm1454_vm4, %v1460_v28, %v1462_v32  ;;  %v4125_v44 = vld [vmem:[%s3815_s24 + $0x10] sm:$0xff]  }
  0x59   : > { %3171 = vmatmul.mubr.bf16.gmra.mrb[12].mxu0 %v1287_v48  ;;  %3030 = vmatprep.mubr.msk.bf16.mxu1 %vm3678_vm0, %v3677_v1  ;;  %v3592_v48 = vld [vmem:[%s4522_s2 + $0x1b8] sm:$0xff]   ;;  %v2039_v52 = vrot.slane %v4125_v44, 3  ;;  %v1659_v8 = vrot.slane %v4125_v44, 2 }
  0x5a   : > { %3174 = vmatprep.mubr.msk.bf16.mxu0 %vm3678_vm0, %v3677_v1  ;;  %3191 = vmatpush3.bf16.msra.mxu0 %v3571_v45  ;;  %v1084_v45 = vrot.slane %v3624_v36, 1  ;;  %v3615_v36 = vld [vmem:[%s4522_s2 + $0x1f8] sm:$0xff]  }
  0x5b   : > { %3047 = vmatpush3.bf16.msra.mxu1 %v3574_v51  ;;  %3192 = vmatprep.subr.bf16.mxu0 %v3677_v1  ;;  %v2840_v51 = vcombine.low %v2016_v46, %v1603_v41 }
  0x5c   : > { %3048 = vmatprep.subr.bf16.mxu1 %v3677_v1  ;;  %v4148_v50 = vsel %vm871_vm3, %v1082_v2, %v1084_v45  ;;  %v4179_v2 = vsel %vm2037_vm5, %v2043_v57, %v2045_v61  ;;  %v2229_v57 = vld [vmem:[%s4525_s5] sm:$0x3] }
  0x5d   : > { %v2038_v7 = vrot.slane %v2840_v51, 3 }
  0x5e   : > { %3193 = vmatpush3.bf16.msra.mxu0 %v3575_v21  ;;  %v4166_v21 = vsel %vm2037_vm5, %v2039_v52, %v2041_v56  ;;  %v1845_v56 = vshrl.u32 %v4134_v26, 16 }
  0x5f   : > { %3049 = vmatpush3.bf16.msra.mxu1 %v3576_v62  ;;  %3214 = vmatprep.subr.bf16.mxu0 %v3677_v1  ;;  %v4171_v62 = vsel %vm2037_vm5, %v2038_v7, %v2039_v52  ;;  %v1848_v7 = vshll.u32 %v4134_v26, 16 }
  0x60   : > { %3031 = vmatmul.mubr.bf16.gmra.mrb[16].mxu1 %v597_v3  ;;  %3070 = vmatprep.subr.bf16.mxu1 %v3677_v1  ;;  %v1465_v3 = vsel %vm1454_vm4, %v1462_v32, %v1464_v38  ;;  %v3614_v32 = vld [vmem:[%s4522_s2 + $0xf0] sm:$0xff]  }
  0x61   : > { %3175 = vmatmul.mubr.bf16.gmra.mrb[16].mxu0 %v1296_v5  ;;  %3050 = vmatprep.mubr.msk.bf16.mxu1 %vm3678_vm0, %v3677_v1  ;;  %v4182_v5 = vcombine.low %v1602_v54, %v1603_v41  ;;  %v1839_v41 = vshll.u32 %v4125_v44, 16 }
  0x62   : > { %3194 = vmatprep.mubr.msk.bf16.mxu0 %vm3678_vm0, %v3677_v1 }
  0x63   : > { %v1658_v6 = vrot.slane %v4182_v5, 2  ;;  %v1831_v38 = vshll.u32 %v4182_v5, 16  ;;  %v1841_v52 = vrot.slane %v1839_v41, 3 }
  0x65   : > { %v1660_v12 = vsel %vm1454_vm4, %v1658_v6, %v1659_v8  ;;  %v1847_v6 = vrot.slane %v1845_v56, 2 }
  0x68   : > { %3051 = vmatmul.mubr.bf16.vlgmr.msra.gmra.mrb[0].mxu1 %v3833_v14  ;;  %v3582_v14 = vld [vmem:[%s4522_s2 + $0x190] sm:$0xff]  }
  0x69   : > { %3195 = vmatmul.mubr.bf16.vlgmr.msra.gmra.mrb[0].mxu0 %v1457_v20  ;;  %3071 = vmatpush3.bf16.msra.mxu1 %v3579_v13  ;;  %v3599_v13 = vld [vmem:[%s4522_s2 + $0x1c8] sm:$0xff]   ;;  %v1661_v20 = vrot.slane %v4134_v26, 2 }
  0x6a   : > { %3215 = vmatpush3.bf16.msra.mxu0 %v3578_v22  ;;  %3054 = vmatprep.mubr.msk.bf16.mxu1 %vm3678_vm0, %v3677_v1  ;;  %v3602_v22 = vld [vmem:[%s4522_s2 + $0x1d0] sm:$0xff]   ;;  %v3618_v26 = vld [vmem:[%s4522_s2 + $0x208] sm:$0xff]  }
  0x6b   : > { %3216 = vmatprep.subr.bf16.mxu0 %v3677_v1  ;;  %3198 = vmatprep.mubr.msk.bf16.mxu0 %vm3678_vm0, %v3677_v1 }
  0x6c   : > { %3072 = vmatprep.subr.bf16.mxu1 %v3677_v1 }
  0x6d   : > { %3073 = vmatpush3.bf16.msra.mxu1 %v3581_v16  ;;  %v3603_v16 = vld [vmem:[%s4522_s2 + $0xd0] sm:$0xff]  }
  0x6e   : > { %3217 = vmatpush3.bf16.msra.mxu0 %v3580_v23  ;;  %3074 = vmatprep.subr.bf16.mxu1 %v3677_v1  ;;  %v877_v23 = vrot.slane %v3906_v58, 1 }
  0x6f   : > { %3218 = vmatprep.subr.bf16.mxu0 %v3677_v1 }
  0x70   : > { %3055 = vmatmul.mubr.bf16.gmra.mrb[4].mxu1 %v3836_v15  ;;  %v1461_v15 = vsel %vm1454_vm4, %v1458_v24, %v1460_v28  ;;  %v1663_v24 = vrot.slane %v4143_v49, 2  ;;  %v3610_v28 = vld [vmem:[%s4522_s2 + $0x1e8] sm:$0xff]  }
  0x71   : > { %3199 = vmatmul.mubr.bf16.gmra.mrb[4].mxu0 %v1459_v25  ;;  %3058 = vmatprep.mubr.msk.bf16.mxu1 %vm3678_vm0, %v3677_v1  ;;  %v3606_v25 = vld [vmem:[%s4522_s2 + $0xd8] sm:$0xff]  }
  0x72   : > { %3219 = vmatpush3.bf16.msra.mxu0 %v3582_v14  ;;  %3075 = vmatpush3.bf16.msra.mxu1 %v3583_v40  ;;  %v3605_v14 = vld [vmem:[%s4522_s2 + $0x1d8] sm:$0xff]   ;;  %v3607_v40 = vld [vmem:[%s4522_s2 + $0x1e0] sm:$0xff]  }
  0x73   : > { %3202 = vmatprep.mubr.msk.bf16.mxu0 %vm3678_vm0, %v3677_v1  ;;  %3220 = vmatprep.subr.bf16.mxu0 %v3677_v1 }
  0x74   : > { %3076 = vmatprep.subr.bf16.mxu1 %v3677_v1 }
  0x76   : > { %3221 = vmatpush3.bf16.msra.mxu0 %v3584_v27  ;;  %3077 = vmatpush3.bf16.msra.mxu1 %v3585_v29  ;;  %v3609_v27 = vld [vmem:[%s4522_s2 + $0xe0] sm:$0xff]   ;;  %v3611_v29 = vld [vmem:[%s4522_s2 + $0xe8] sm:$0xff]  }
  0x77   : > { %3222 = vmatprep.subr.bf16.mxu0 %v3677_v1  ;;  %3078 = vmatprep.subr.bf16.mxu1 %v3677_v1 }
  0x78   : > { %3059 = vmatmul.mubr.bf16.gmra.mrb[8].mxu1 %v3875_v37  ;;  %v879_v37 = vrot.slane %v3934_v10, 1 }
  0x79   : > { %3203 = vmatmul.mubr.bf16.gmra.mrb[8].mxu0 %v1461_v15  ;;  %3062 = vmatprep.mubr.msk.bf16.mxu1 %vm3678_vm0, %v3677_v1 }
  0x7a   : > { %3223 = vmatpush3.bf16.msra.mxu0 %v3586_v53  ;;  %3206 = vmatprep.mubr.msk.bf16.mxu0 %vm3678_vm0, %v3677_v1  ;;  %v3612_v53 = vld [vmem:[%s4522_s2 + $0x1f0] sm:$0xff]  }
  0x7b   : > { %3079 = vmatpush3.bf16.msra.mxu1 %v3587_v31  ;;  %3224 = vmatprep.subr.bf16.mxu0 %v3677_v1  ;;  %v3613_v31 = vld [vmem:[%s3815_s24 + $0x30] ss:$0 sps:$4 sm:$0x33]  }
  0x7c   : > { %3080 = vmatprep.subr.bf16.mxu1 %v3677_v1 }
  0x7e   : > { %3225 = vmatpush3.bf16.msra.mxu0 %v3588_v33  ;;  %v881_v33 = vrot.slane %v3959_v30, 1  ;;  %v3616_v30 = vld [vmem:[%s4522_s2 + $0xf8] sm:$0xff]  }
  0x7f   : > { %3081 = vmatpush3.bf16.msra.mxu1 %v3589_v34  ;;  %3226 = vmatprep.subr.bf16.mxu0 %v3677_v1  ;;  %v1828_v34 = vshrl.u32 %v4182_v5, 16  ;;  %v2273_v5 = vsel %vm2271_vm7, %v2229_v57, 0  ;;  %v4425_v57 = vld [vmem:[%s4523_s3] ss:$0 sm:$0xff] }
  0x80   : > { %3063 = vmatmul.mubr.bf16.gmra.mrb[12].mxu1 %v3906_v58  ;;  %3082 = vmatprep.subr.bf16.mxu1 %v3677_v1  ;;  %v878_v58 = vsel %vm871_vm3, %v875_v42, %v877_v23  ;;  %v1665_v42 = vrot.slane %v4155_v55, 2 }
  0x81   : > { %3207 = vmatmul.mubr.bf16.gmra.mrb[12].mxu0 %v1463_v43  ;;  %3066 = vmatprep.mubr.msk.bf16.mxu1 %vm3678_vm0, %v3677_v1  ;;  %v882_v43 = vsel %vm871_vm3, %v879_v37, %v881_v33  ;;  %v1830_v45 = vrot.slane %v1828_v34, 2 }
  0x82   : > { %3210 = vmatprep.mubr.msk.bf16.mxu0 %vm3678_vm0, %v3677_v1  ;;  %3227 = vmatpush3.bf16.msra.mxu0 %v3590_v35  ;;  %v1666_v15 = vsel %vm1454_vm4, %v1663_v24, %v1665_v42  ;;  %v1667_v35 = vrot.slane %v3613_v31, 2  ;;  %v3632_v31 = vld [vmem:[%s4130_s12 + $0xb0] sm:$0xff]  }
  0x83   : > { %3083 = vmatpush3.bf16.msra.mxu1 %v3591_v39  ;;  %3228 = vmatprep.subr.bf16.mxu0 %v3677_v1  ;;  %v1836_v39 = vshrl.u32 %v4125_v44, 16 }
  0x84   : > { %3084 = vmatprep.subr.bf16.mxu1 %v3677_v1  ;;  %v1668_v46 = vsel %vm1454_vm4, %v1665_v42, %v1667_v35 }
  0x85   : > { %v1838_v51 = vrot.slane %v1836_v39, 2 }
  0x86   : > { %3229 = vmatpush3.bf16.msra.mxu0 %v3592_v48  ;;  %v1833_v48 = vrot.slane %v1831_v38, 3 }
  0x87   : > { %3085 = vmatpush3.bf16.msra.mxu1 %v3593_v59  ;;  %3250 = vmatprep.subr.bf16.mxu0 %v3677_v1  ;;  %v1842_v54 = vor.u32 %v1841_v52, %v1838_v51 }
  0x88   : > { %3067 = vmatmul.mubr.bf16.gmra.mrb[16].mxu1 %v3934_v10  ;;  %3106 = vmatprep.subr.bf16.mxu1 %v3677_v1  ;;  %v880_v10 = vsel %vm871_vm3, %v877_v23, %v879_v37  ;;  %v1834_v44 = vor.u32 %v1833_v48, %v1830_v45  ;;  %v3621_v23 = vld [vmem:[%s4522_s2 + $0x220] sm:$0xff]  }
  0x89   : > { %3211 = vmatmul.mubr.bf16.gmra.mrb[16].mxu0 %v1465_v3  ;;  %3086 = vmatprep.mubr.msk.bf16.mxu1 %vm3678_vm0, %v3677_v1  ;;  %v3617_v3 = vld [vmem:[%s4522_s2 + $0x200] sm:$0xff]  }
  0x8a   : > { %3230 = vmatprep.mubr.msk.bf16.mxu0 %vm3678_vm0, %v3677_v1  ;;  %v1843_v59 = vsel %vm1826_vm6, %v1834_v44, %v1842_v54 }
  0x90   : > { %3087 = vmatmul.mubr.bf16.vlgmr.msra.gmra.mrb[0].mxu1 %v4044_v19  ;;  %v1662_v19 = vsel %vm1454_vm4, %v1659_v8, %v1661_v20  ;;  %v1850_v8 = vrot.slane %v1848_v7, 3 }
  0x91   : > { %3231 = vmatmul.mubr.bf16.vlgmr.msra.gmra.mrb[0].mxu0 %v1660_v12  ;;  %3107 = vmatpush3.bf16.msra.mxu1 %v3598_v11  ;;  %v1854_v12 = vshrl.u32 %v4143_v49, 16 }
  0x92   : > { %3251 = vmatpush3.bf16.msra.mxu0 %v3597_v18  ;;  %3090 = vmatprep.mubr.msk.bf16.mxu1 %vm3678_vm0, %v3677_v1  ;;  %v1851_v11 = vor.u32 %v1850_v8, %v1847_v6  ;;  %v1857_v18 = vshll.u32 %v4143_v49, 16 }
  0x93   : > { %3252 = vmatprep.subr.bf16.mxu0 %v3677_v1  ;;  %3234 = vmatprep.mubr.msk.bf16.mxu0 %vm3678_vm0, %v3677_v1 }
  0x94   : > { %3108 = vmatprep.subr.bf16.mxu1 %v3677_v1 }
  0x95   : > { %3109 = vmatpush3.bf16.msra.mxu1 %v3601_v17  ;;  %v3619_v17 = vld [vmem:[%s4522_s2 + $0x210] sm:$0xff]  }
  0x96   : > { %3253 = vmatpush3.bf16.msra.mxu0 %v3599_v13  ;;  %3110 = vmatprep.subr.bf16.mxu1 %v3677_v1  ;;  %v1856_v13 = vrot.slane %v1854_v12, 2  ;;  %v4436_v12 = vld [vmem:[%s4527_s7] ss:$0 sm:$0xff] }
  0x97   : > { %3254 = vmatprep.subr.bf16.mxu0 %v3677_v1 }
  0x98   : > { %3091 = vmatmul.mubr.bf16.gmra.mrb[4].mxu1 %v3991_v47  ;;  %v1664_v47 = vsel %vm1454_vm4, %v1661_v20, %v1663_v24  ;;  %v1859_v20 = vrot.slane %v1857_v18, 3 }
  0x99   : > { %3235 = vmatmul.mubr.bf16.gmra.mrb[4].mxu0 %v1662_v19  ;;  %3094 = vmatprep.mubr.msk.bf16.mxu1 %vm3678_vm0, %v3677_v1  ;;  %v3620_v19 = vld [vmem:[%s4522_s2 + $0x218] sm:$0xff]  }
  0x9a   : > { %3255 = vmatpush3.bf16.msra.mxu0 %v3602_v22  ;;  %3111 = vmatpush3.bf16.msra.mxu1 %v3603_v16  ;;  %v1860_v49 = vor.u32 %v1859_v20, %v1856_v13  ;;  %v1863_v22 = vshrl.u32 %v4155_v55, 16  ;;  %v1866_v16 = vshll.u32 %v4155_v55, 16 }
  0x9b   : > { %3238 = vmatprep.mubr.msk.bf16.mxu0 %vm3678_vm0, %v3677_v1  ;;  %3256 = vmatprep.subr.bf16.mxu0 %v3677_v1 }
  0x9c   : > { %3112 = vmatprep.subr.bf16.mxu1 %v3677_v1  ;;  %v1865_v24 = vrot.slane %v1863_v22, 2 }
  0x9e   : > { %3257 = vmatpush3.bf16.msra.mxu0 %v3605_v14  ;;  %3113 = vmatpush3.bf16.msra.mxu1 %v3606_v25  ;;  %v1868_v14 = vrot.slane %v1866_v16, 3  ;;  %v3625_v25 = vld [vmem:[%s3815_s24 + $0x30] ss:$0 sps:$4 sm:$0x77]  }
  0x9f   : > { %3258 = vmatprep.subr.bf16.mxu0 %v3677_v1  ;;  %3114 = vmatprep.subr.bf16.mxu1 %v3677_v1 }
  0xa0   : > { %3095 = vmatmul.mubr.bf16.gmra.mrb[8].mxu1 %v878_v58  ;;  %v1869_v58 = vor.u32 %v1868_v14, %v1865_v24 }
  0xa1   : > { %3239 = vmatmul.mubr.bf16.gmra.mrb[8].mxu0 %v1664_v47  ;;  %3098 = vmatprep.mubr.msk.bf16.mxu1 %vm3678_vm0, %v3677_v1  ;;  %v3622_v47 = vld [vmem:[%s4522_s2 + $0x228] sm:$0xff]  }
  0xa2   : > { %3259 = vmatpush3.bf16.msra.mxu0 %v3607_v40  ;;  %3242 = vmatprep.mubr.msk.bf16.mxu0 %vm3678_vm0, %v3677_v1  ;;  %v1872_v40 = vshrl.u32 %v3625_v25, 16  ;;  %v1870_v37 = vsel %vm1826_vm6, %v1860_v49, %v1869_v58 }
  0xa3   : > { %3115 = vmatpush3.bf16.msra.mxu1 %v3609_v27  ;;  %3260 = vmatprep.subr.bf16.mxu0 %v3677_v1  ;;  %v1875_v27 = vshll.u32 %v3625_v25, 16 }
  0xa4   : > { %3116 = vmatprep.subr.bf16.mxu1 %v3677_v1  ;;  %v1874_v42 = vrot.slane %v1872_v40, 2 }
  0xa6   : > { %3261 = vmatpush3.bf16.msra.mxu0 %v3610_v28  ;;  %v1877_v28 = vrot.slane %v1875_v27, 3 }
  0xa7   : > { %3117 = vmatpush3.bf16.msra.mxu1 %v3611_v29  ;;  %3262 = vmatprep.subr.bf16.mxu0 %v3677_v1 }
  0xa8   : > { %3099 = vmatmul.mubr.bf16.gmra.mrb[12].mxu1 %v880_v10  ;;  %3118 = vmatprep.subr.bf16.mxu1 %v3677_v1  ;;  %v1878_v29 = vor.u32 %v1877_v28, %v1874_v42  ;;  %v3626_v10 = vld [vmem:[%s4522_s2 + $0x238] sm:$0xff]  }
  0xa9   : > { %3243 = vmatmul.mubr.bf16.gmra.mrb[12].mxu0 %v1666_v15  ;;  %3102 = vmatprep.mubr.msk.bf16.mxu1 %vm3678_vm0, %v3677_v1 }
  0xaa   : > { %3246 = vmatprep.mubr.msk.bf16.mxu0 %vm3678_vm0, %v3677_v1  ;;  %3263 = vmatpush3.bf16.msra.mxu0 %v3612_v53  ;;  %v1879_v15 = vsel %vm1826_vm6, %v1869_v58, %v1878_v29  ;;  %v3630_v53 = vld [vmem:[%s4130_s12 + $0xa0] sm:$0xff]  }
  0xab   : > { %3119 = vmatpush3.bf16.msra.mxu1 %v3614_v32  ;;  %3264 = vmatprep.subr.bf16.mxu0 %v3677_v1 }
  0xac   : > { %3120 = vmatprep.subr.bf16.mxu1 %v3677_v1 }
  0xae   : > { %3265 = vmatpush3.bf16.msra.mxu0 %v3615_v36 }
  0xaf   : > { %3121 = vmatpush3.bf16.msra.mxu1 %v3616_v30  ;;  %3286 = vmatprep.subr.bf16.mxu0 %v3677_v1 }
  0xb0   : > { %3103 = vmatmul.mubr.bf16.gmra.mrb[16].mxu1 %v882_v43  ;;  %3322 = vmatprep.subr.bf16.mxu1 %v3677_v1 }
  0xb1   : > { %3247 = vmatmul.mubr.bf16.gmra.mrb[16].mxu0 %v1668_v46  ;;  %3122 = vmatprep.mubr.msk.bf16.mxu1 %vm3678_vm0, %v3677_v1 }
  0xb2   : > { %3266 = vmatprep.mubr.msk.bf16.mxu0 %vm3678_vm0, %v3677_v1 }
  0xb8   : > { %3123 = vmatmul.mubr.bf16.vlgmr.msra.gmra.mrb[0].mxu1 %v4010_v60  ;;  %v1852_v60 = vsel %vm1826_vm6, %v1842_v54, %v1851_v11  ;;  %v4420_v54 = vld [vmem:[%s4526_s6] ss:$0 sm:$0xff] }
  0xb9   : > { %3267 = vmatmul.mubr.bf16.vlgmr.msra.gmra.mrb[0].mxu0 %v1843_v59  ;;  %3323 = vmatpush3.bf16.msra.mxu1 %v2273_v5 }
  0xba   : > { %3287 = vmatpush3.bf16.msra.mxu0 %v3617_v3  ;;  %3126 = vmatprep.mubr.msk.bf16.mxu1 %vm3678_vm0, %v3677_v1 }
  0xbb   : > { %3288 = vmatprep.subr.bf16.mxu0 %v3677_v1  ;;  %3270 = vmatprep.mubr.msk.bf16.mxu0 %vm3678_vm0, %v3677_v1 }
  0xbe   : > { %3289 = vmatpush3.bf16.msra.mxu0 %v3618_v26  ;;  %v4431_v26 = vld [vmem:[%s4524_s4] ss:$0 sm:$0xff] }
  0xbf   : > { %3290 = vmatprep.subr.bf16.mxu0 %v3677_v1 }
  0xc0   : > { %3127 = vmatmul.mubr.bf16.gmra.mrb[4].mxu1 %v4020_v0  ;;  %v1861_v0 = vsel %vm1826_vm6, %v1851_v11, %v1860_v49 }
  0xc1   : > { %3271 = vmatmul.mubr.bf16.gmra.mrb[4].mxu0 %v1852_v60  ;;  %3130 = vmatprep.mubr.msk.bf16.mxu1 %vm3678_vm0, %v3677_v1 }
  0xc2   : > { %3291 = vmatpush3.bf16.msra.mxu0 %v3619_v17  ;;  %3274 = vmatprep.mubr.msk.bf16.mxu0 %vm3678_vm0, %v3677_v1 }
  0xc3   : > { %3292 = vmatprep.subr.bf16.mxu0 %v3677_v1 }
  0xc6   : > { %3293 = vmatpush3.bf16.msra.mxu0 %v3620_v19 }
  0xc7   : > { %3294 = vmatprep.subr.bf16.mxu0 %v3677_v1 }
  0xc8   : > { %3131 = vmatmul.mubr.bf16.gmra.mrb[8].mxu1 %v4025_v4  ;;  %v3623_v4 = vld [vmem:[%s4522_s2 + $0x230] sm:$0xff]  }
  0xc9   : > { %3275 = vmatmul.mubr.bf16.gmra.mrb[8].mxu0 %v1861_v0  ;;  %3134 = vmatprep.mubr.msk.bf16.mxu1 %vm3678_vm0, %v3677_v1 }
  0xca   : > { %3295 = vmatpush3.bf16.msra.mxu0 %v3621_v23  ;;  %3278 = vmatprep.mubr.msk.bf16.mxu0 %vm3678_vm0, %v3677_v1 }
  0xcb   : > { %3296 = vmatprep.subr.bf16.mxu0 %v3677_v1 }
  0xce   : > { %3297 = vmatpush3.bf16.msra.mxu0 %v3622_v47 }
  0xcf   : > { %3298 = vmatprep.subr.bf16.mxu0 %v3677_v1 }
  0xd0   : > { %3135 = vmatmul.mubr.bf16.gmra.mrb[12].mxu1 %v4033_v9  ;;  %v3628_v9 = vld [vmem:[%s4130_s12 + $0x90] sm:$0xff]  }
  0xd1   : > { %3279 = vmatmul.mubr.bf16.gmra.mrb[12].mxu0 %v1870_v37  ;;  %3138 = vmatprep.mubr.msk.bf16.mxu1 %vm3678_vm0, %v3677_v1 }
  0xd2   : > { %3282 = vmatprep.mubr.msk.bf16.mxu0 %vm3678_vm0, %v3677_v1  ;;  %3299 = vmatpush3.bf16.msra.mxu0 %v3623_v4 }
  0xd3   : > { %3300 = vmatprep.subr.bf16.mxu0 %v3677_v1 }
  0xd6   : > { %3301 = vmatpush3.bf16.msra.mxu0 %v3626_v10 }
  0xd8   : > { %3139 = vmatmul.mubr.bf16.gmra.mrb[16].mxu1 %v4148_v50  ;;  %v3629_v50 = vld [vmem:[%s4130_s12 + $0x98] sm:$0xff]  }
  0xd9   : > { %3283 = vmatmul.mubr.bf16.gmra.mrb[16].mxu0 %v1879_v15  ;;  %3324 = vmatprep.mubr.msk.bf16.mxu1 %vm3678_vm0, %v3677_v1 }
  0xda   : > { %3302 = vmatprep.mubr.msk.bf16.mxu0 %vm3678_vm0, %v3677_v1 }
  0xe0   : > { %3325 = vmatmul.mubr.msk.bf16.vlgmr.msra.gmra.mrb[20].mxu1 %vm2255_vm8, %v3628_v9 }
  0xe1   : > { %3303 = vmatmul.mubr.bf16.vlgmr.msra.gmra.mrb[0].mxu0 %v4171_v62  ;;  %3328 = vmatprep.mubr.msk.bf16.mxu1 %vm3678_vm0, %v3677_v1  ;;  %v3631_v62 = vld [vmem:[%s4130_s12 + $0xa8] sm:$0xff]   ;;  %s2382_s12 = sld [smem:[#allocation2 + %s3666_s30]] }
  0xe2   : > { %3306 = vmatprep.mubr.msk.bf16.mxu0 %vm3678_vm0, %v3677_v1 }
  0xe7   : > { %v4439_v20 = vstv %s2382_s12 }
  0xe8   : > { %3329 = vmatmul.mubr.msk.bf16.gmra.mrb[24].mxu1 %vm2255_vm8, %v3629_v50 }
  0xe9   : > { %3307 = vmatmul.mubr.bf16.gmra.mrb[4].mxu0 %v4166_v21  ;;  %3332 = vmatprep.mubr.msk.bf16.mxu1 %vm3678_vm0, %v3677_v1  ;;  %v2047_v21 = vrot.slane %v3625_v25, 3 }
  0xea   : > { %3310 = vmatprep.mubr.msk.bf16.mxu0 %vm3678_vm0, %v3677_v1 }
  0xf0   : > { %3333 = vmatmul.mubr.msk.bf16.gmra.mrb[28].mxu1 %vm2255_vm8, %v3630_v53 }
  0xf1   : > { %3311 = vmatmul.mubr.bf16.gmra.mrb[8].mxu0 %v4174_v63  ;;  %3336 = vmatprep.mubr.msk.bf16.mxu1 %vm3678_vm0, %v3677_v1  ;;  %v2048_v63 = vsel %vm2037_vm5, %v2045_v61, %v2047_v21 }
  0xf2   : > { %3314 = vmatprep.mubr.msk.bf16.mxu0 %vm3678_vm0, %v3677_v1 }
  0xf8   : > { %3337 = vmatmul.mubr.msk.bf16.gmra.mrb[32].mxu1 %vm2255_vm8, %v3631_v62 }
  0xf9   : > { %3315 = vmatmul.mubr.bf16.gmra.mrb[12].mxu0 %v4179_v2  ;;  %3340 = vmatprep.mubr.msk.bf16.mxu1 %vm3678_vm0, %v3677_v1 }
  0xfa   : > { %3318 = vmatprep.mubr.msk.bf16.mxu0 %vm3678_vm0, %v3677_v1 }
 0x100   : > { %3341 = vmatmul.mubr.msk.bf16.gmra.mrb[36].mxu1 %vm2255_vm8, %v3632_v31 }
 0x101   : > { %3319 = vmatmul.mubr.bf16.gmra.mrb[16].mxu0 %v2048_v63 }
 0x18b   : > { %v1173_v32 = vpop.f32.mrb[0].mxu1 }
 0x18c   : > { %v3124_v33 = vpop.f32.mrb[1].mxu1 }
 0x18d   : > { %v1176_v34 = vpop.f32.mrb[2].mxu1 }
 0x18e   : > { %v3125_v35 = vpop.f32.mrb[3].mxu1 }
 0x193   : > { %v1181_v2 = vpop.f32.mrb[4].mxu1 }
 0x194   : > { %v3128_v36 = vpop.f32.mrb[5].mxu1 }
 0x195   : > { %v1184_v38 = vpop.f32.mrb[6].mxu1 }
 0x196   : > { %v3129_v39 = vpop.f32.mrb[7].mxu1 }
 0x19b   : > { %v4404_v41 = vpop.f32.mrb[8].mxu1 }
 0x19c   : > { %v3132_v1 = vpop.f32.mrb[9].mxu1 }
 0x19d   : > { %v4406_v30 = vpop.f32.mrb[10].mxu1 }
 0x19e   : > { %v3133_v55 = vpop.f32.mrb[11].mxu1 }
 0x1a3   : > { %v4408_v43 = vpop.f32.mrb[12].mxu1 }
 0x1a4   : > { %v3136_v61 = vpop.f32.mrb[13].mxu1 }
 0x1a5   : > { %v4410_v45 = vpop.f32.mrb[14].mxu1 }
 0x1a6   : > { %v3137_v46 = vpop.f32.mrb[15].mxu1 }
 0x1ab   : > { %v4412_v48 = vpop.f32.mrb[16].mxu1 }
 0x1ac   : > { %v3140_v51 = vpop.f32.mrb[17].mxu1 }
 0x1ad   : > { %v4414_v52 = vpop.f32.mrb[18].mxu1 }
 0x1ae   : > { %v3141_v44 = vpop.f32.mrb[19].mxu1 }
 0x1b3   : > { %v2309_v56 = vpop.f32.mrb[20].mxu1 }
 0x1b4   : > { %v2136_v7 = vpop.f32.mrb[0].mxu0  ;;  %v3326_v59 = vpop.f32.mrb[21].mxu1  ;;  %v2355_v6 = vmul.f32 %v4420_v54, %v2309_v56 }
 0x1b5   : > { %v3344_v3 = vadd.f32 %v2136_v7, %v1173_v32  ;;  %v3304_v5 = vpop.f32.mrb[1].mxu0  ;;  %v2312_v8 = vpop.f32.mrb[22].mxu1 }
 0x1b6   : > { %v2139_v11 = vpop.f32.mrb[2].mxu0  ;;  %v3327_v18 = vpop.f32.mrb[23].mxu1  ;;  %v2372_v22 = vadd.f32 %v4436_v12, %v2355_v6  ;;  %v2356_v16 = vmul.f32 %v4420_v54, %v2312_v8 }
 0x1b7   : > { %v2192_v60 = vmul.f32 %v3344_v3, %v4425_v57  ;;  %v3345_v17 = vadd.f32 %v2139_v11, %v1176_v34  ;;  %v3305_v13 = vpop.f32.mrb[3].mxu0 }
 0x1b8   : > { %v2373_v40 = vadd.f32 %v4436_v12, %v2356_v16 }
 0x1b9   : > { %v2209_v49 = vadd.f32 %v4431_v26, %v2192_v60  ;;  %v2193_v19 = vmul.f32 %v3345_v17, %v4425_v57 }
 0x1bb   : > { %v2210_v0 = vadd.f32 %v4431_v26, %v2193_v19  ;;  %v2384_v23 = vmul.f32 %v4439_v20, %v2209_v49  ;;  %v2317_v24 = vpop.f32.mrb[24].mxu1 }
 0x1bc   : > { %v2144_v14 = vpop.f32.mrb[4].mxu0  ;;  %v2357_v25 = vmul.f32 %v4420_v54, %v2317_v24  ;;  %v3330_v58 = vpop.f32.mrb[25].mxu1 }
 0x1bd   : > { %v2394_v47 = vadd.f32 %v2384_v23, %v2372_v22  ;;  %v2385_v27 = vmul.f32 %v4439_v20, %v2210_v0  ;;  %v3346_v37 = vadd.f32 %v2144_v14, %v1181_v2  ;;  %v3308_v4 = vpop.f32.mrb[5].mxu0  ;;  %v2320_v42 = vpop.f32.mrb[26].mxu1 }
 0x1be   : > { %v2147_v28 = vpop.f32.mrb[6].mxu0  ;;  %v3331_v29 = vpop.f32.mrb[27].mxu1  ;;  %v2374_v62 = vadd.f32 %v4436_v12, %v2357_v25  ;;  %v2358_v32 = vmul.f32 %v4420_v54, %v2320_v42 }
 0x1bf   : > { %v2404_v10 = vmax.f32 %v2394_v47, 0.0  ;;  %v2395_v15 = vadd.f32 %v2385_v27, %v2373_v40  ;;  %v2194_v9 = vmul.f32 %v3346_v37, %v4425_v57  ;;  %v3347_v50 = vadd.f32 %v2147_v28, %v1184_v38  ;;  %v3309_v53 = vpop.f32.mrb[7].mxu0 }
 0x1c0   : > { %v2375_v1 = vadd.f32 %v4436_v12, %v2358_v32 }
 0x1c1   : > { %2414 = vst [vmem:[%s4454_s29] sm:$0xff] %v2404_v10  ;;  %v2405_v21 = vmax.f32 %v2395_v15, 0.0  ;;  %v2211_v31 = vadd.f32 %v4431_v26, %v2194_v9  ;;  %v2195_v63 = vmul.f32 %v3347_v50, %v4425_v57 }
 0x1c3   : > { %2415 = vst [vmem:[%s4454_s29 + $0x8] sm:$0xff] %v2405_v21  ;;  %v2212_v33 = vadd.f32 %v4431_v26, %v2195_v63  ;;  %v2386_v34 = vmul.f32 %v4439_v20, %v2211_v31  ;;  %v2325_v35 = vpop.f32.mrb[28].mxu1 }
 0x1c4   : > { %v2152_v2 = vpop.f32.mrb[8].mxu0  ;;  %v2359_v36 = vmul.f32 %v4420_v54, %v2325_v35  ;;  %v3334_v38 = vpop.f32.mrb[29].mxu1 }
 0x1c5   : > { %v2396_v39 = vadd.f32 %v2386_v34, %v2374_v62  ;;  %v2387_v55 = vmul.f32 %v4439_v20, %v2212_v33  ;;  %v3348_v61 = vadd.f32 %v2152_v2, %v4404_v41  ;;  %v3312_v46 = vpop.f32.mrb[9].mxu0  ;;  %v2328_v51 = vpop.f32.mrb[30].mxu1 }
 0x1c6   : > { %v2155_v44 = vpop.f32.mrb[10].mxu0  ;;  %v3335_v56 = vpop.f32.mrb[31].mxu1  ;;  %v2376_v8 = vadd.f32 %v4436_v12, %v2359_v36  ;;  %v2360_v60 = vmul.f32 %v4420_v54, %v2328_v51 }
 0x1c7   : > { %v2406_v7 = vmax.f32 %v2396_v39, 0.0  ;;  %v2397_v59 = vadd.f32 %v2387_v55, %v2375_v1  ;;  %v2196_v3 = vmul.f32 %v3348_v61, %v4425_v57  ;;  %v3349_v5 = vadd.f32 %v2155_v44, %v4406_v30  ;;  %v3313_v6 = vpop.f32.mrb[11].mxu0 }
 0x1c8   : > { %v2377_v0 = vadd.f32 %v4436_v12, %v2360_v60 }
 0x1c9   : > { %2416 = vst [vmem:[%s4454_s29 + $0x10] sm:$0xff] %v2406_v7  ;;  %v2407_v11 = vmax.f32 %v2397_v59, 0.0  ;;  %v2213_v18 = vadd.f32 %v4431_v26, %v2196_v3  ;;  %v2197_v41 = vmul.f32 %v3349_v5, %v4425_v57 }
 0x1cb   : > { %2417 = vst [vmem:[%s4454_s29 + $0x18] sm:$0xff] %v2407_v11  ;;  %v2214_v17 = vadd.f32 %v4431_v26, %v2197_v41  ;;  %v2388_v13 = vmul.f32 %v4439_v20, %v2213_v18  ;;  %v2333_v49 = vpop.f32.mrb[32].mxu1 }
 0x1cc   : > { %v2160_v19 = vpop.f32.mrb[12].mxu0  ;;  %v2361_v30 = vmul.f32 %v4420_v54, %v2333_v49  ;;  %v3338_v22 = vpop.f32.mrb[33].mxu1 }
 0x1cd   : > { %v2398_v16 = vadd.f32 %v2388_v13, %v2376_v8  ;;  %v2389_v23 = vmul.f32 %v4439_v20, %v2214_v17  ;;  %v3350_v24 = vadd.f32 %v2160_v19, %v4408_v43  ;;  %v3316_v14 = vpop.f32.mrb[13].mxu0  ;;  %v2336_v25 = vpop.f32.mrb[34].mxu1 }
 0x1ce   : > { %v2163_v58 = vpop.f32.mrb[14].mxu0  ;;  %v3339_v47 = vpop.f32.mrb[35].mxu1  ;;  %v2378_v28 = vadd.f32 %v4436_v12, %v2361_v30  ;;  %v2362_v15 = vmul.f32 %v4420_v54, %v2336_v25 }
 0x1cf   : > { %v2408_v40 = vmax.f32 %v2398_v16, 0.0  ;;  %v2399_v27 = vadd.f32 %v2389_v23, %v2377_v0  ;;  %v2198_v37 = vmul.f32 %v3350_v24, %v4425_v57  ;;  %v3351_v4 = vadd.f32 %v2163_v58, %v4410_v45  ;;  %v3317_v42 = vpop.f32.mrb[15].mxu0 }
 0x1d0   : > { %v2379_v63 = vadd.f32 %v4436_v12, %v2362_v15 }
 0x1d1   : > { %2418 = vst [vmem:[%s4454_s29 + $0x20] sm:$0xff] %v2408_v40  ;;  %v2409_v29 = vmax.f32 %v2399_v27, 0.0  ;;  %v2215_v10 = vadd.f32 %v4431_v26, %v2198_v37  ;;  %v2199_v43 = vmul.f32 %v3351_v4, %v4425_v57 }
 0x1d3   : > { %2419 = vst [vmem:[%s4454_s29 + $0x28] sm:$0xff] %v2409_v29  ;;  %v2216_v9 = vadd.f32 %v4431_v26, %v2199_v43  ;;  %v2390_v50 = vmul.f32 %v4439_v20, %v2215_v10  ;;  %v2341_v53 = vpop.f32.mrb[36].mxu1 }
 0x1d4   : > { %v2168_v62 = vpop.f32.mrb[16].mxu0  ;;  %v2363_v45 = vmul.f32 %v4420_v54, %v2341_v53  ;;  %v3342_v21 = vpop.f32.mrb[37].mxu1 }
 0x1d5   : > { %v2400_v31 = vadd.f32 %v2390_v50, %v2378_v28  ;;  %v2391_v32 = vmul.f32 %v4439_v20, %v2216_v9  ;;  %v3352_v33 = vadd.f32 %v2168_v62, %v4412_v48  ;;  %v3320_v34 = vpop.f32.mrb[17].mxu0  ;;  %v2344_v35 = vpop.f32.mrb[38].mxu1 }
 0x1d6   : > { %v2171_v2 = vpop.f32.mrb[18].mxu0  ;;  %v3343_v36 = vpop.f32.mrb[39].mxu1  ;;  %v2380_v46 = vadd.f32 %v4436_v12, %v2363_v45  ;;  %v2364_v56 = vmul.f32 %v4420_v54, %v2344_v35 }
 0x1d7   : > { %v2410_v38 = vmax.f32 %v2400_v31, 0.0  ;;  %v2401_v39 = vadd.f32 %v2391_v32, %v2379_v63  ;;  %v2200_v1 = vmul.f32 %v3352_v33, %v4425_v57  ;;  %v3353_v55 = vadd.f32 %v2171_v2, %v4414_v52  ;;  %v3321_v61 = vpop.f32.mrb[19].mxu0 }
 0x1d8   : > { %v2381_v52 = vadd.f32 %v4436_v12, %v2364_v56 }
 0x1d9   : > { %2420 = vst [vmem:[%s4454_s29 + $0x30] sm:$0xff] %v2410_v38  ;;  %v2411_v51 = vmax.f32 %v2401_v39, 0.0  ;;  %v2217_v48 = vadd.f32 %v4431_v26, %v2200_v1  ;;  %v2201_v44 = vmul.f32 %v3353_v55, %v4425_v57 }
 0x1db   : > { %2421 = vst [vmem:[%s4454_s29 + $0x38] sm:$0xff] %v2411_v51  ;;  %v2218_v7 = vadd.f32 %v4431_v26, %v2201_v44  ;;  %v2392_v59 = vmul.f32 %v4439_v20, %v2217_v48 }
 0x1dd   : > { %v2402_v3 = vadd.f32 %v2392_v59, %v2380_v46  ;;  %v2393_v5 = vmul.f32 %v4439_v20, %v2218_v7 }
 0x1df   : > { %v2412_v6 = vmax.f32 %v2402_v3, 0.0  ;;  %v2403_v8 = vadd.f32 %v2393_v5, %v2381_v52 }
 0x1e1   : > { %2422 = vst [vmem:[%s4454_s29 + $0x40] sm:$0xff] %v2412_v6  ;;  %v2413_v11 = vmax.f32 %v2403_v8, 0.0 }
 0x1e3   : > { %2423 = vst [vmem:[%s4454_s29 + $0x48] sm:$0xff] %v2413_v11 }
 0x1e4 PF: > { %s20_s11 = sadd.s32 1, %s3674_s11   ;;  %s4532_s30 = smov %s3670_s10 }
 0x1e5   : > { %p17_p2 = scmp.ge.s32.totalorder %s20_s11, 4   ;;  %s4533_s10 = smov %s4535_s13 }
 0x1e7   :  { %19 = sbr.rel (!%p17_p2) target bundleno = 2 (0x2), region = 120 }
 0x1ee   :  { %2451 = vsyncpa [#allocation3], 1 }
 0x1ef   :  { %2453 = vsyncpa [#allocation3 + $0x1], 1 }

</bundles_post_ra>
